<compile_context>
chip_gen: v7x
topology: tpu7x:2x2x1
jax: 0.10.0
libtpu: 0.0.40
codegen_flags: <defaults>
</compile_context>

<pallas_src>
import functools

import jax
import jax.numpy as jnp
from jax import lax
from jax.experimental import pallas as pl
from jax.experimental.pallas import tpu as pltpu

LANE = 128      # lane width: last dims padded to a multiple of this
SUBLANE = 8     # sublane width: batch padded to a multiple of this
BLOCK_B = 8     # batch rows per grid step (sublane-aligned)


def _round_up(x, m):
    return ((x + m - 1) // m) * m


# ----------------------------------------------------------------------------
# Pallas kernel: whole forward pass, one batch-block per grid step
# ----------------------------------------------------------------------------
def fused_rnn_kernel(x_ref, wih_ref, whh_ref, b_ref, wfc_ref, bfc_ref,
                     out_ref, seq_ref):
    """x_ref:   (T, Bb, Ep)  time-major, zero-padded embedded input block
    wih_ref: (L, Ep, Hp)  stacked W_ih^T per layer (zero-padded)
    whh_ref: (L, Hp, Hp)  stacked W_hh^T per layer (zero-padded)
    b_ref:   (L, 1,  Hp)  combined b_ih + b_hh per layer (zero-padded)
    wfc_ref: (Hp, Op)     W_fc^T (zero-padded)
    bfc_ref: (1, Op)      b_fc (zero-padded)
    out_ref: (Bb, Op)     logits of the last timestep for this batch block
    seq_ref: (T, Bb, Hp)  VMEM scratch: current layer's sequence
    """
    T, Bb, Ep = x_ref.shape
    L, _, Hp = whh_ref.shape

    h = jnp.zeros((Bb, Hp), jnp.float32)
    for l in range(L):                                   # static layer loop
        # Hoisted input projection: one MXU matmul over all T timesteps.
        if l == 0:
            x_all = x_ref[...].reshape(T * Bb, Ep)
        else:
            x_all = seq_ref[...].reshape(T * Bb, Hp)
        proj = (
            jnp.dot(x_all, wih_ref[l], preferred_element_type=jnp.float32)
            + b_ref[l]
        )
        seq_ref[...] = proj.reshape(T, Bb, Hp)

        # Recurrent weight loaded ONCE per layer -> stays vreg-resident
        # across every unrolled step.
        w_hh = whh_ref[l]
        last_layer = (l == L - 1)

        # Hidden state rides in the loop carry (vregs), not VMEM: removes one
        # vst + one vld from every step of the latency-bound serial chain.
        # Note: padded batch rows become tanh(bias) != 0; they never mix into
        # real rows (matmuls contract only the lane/hidden axis) and are
        # sliced off in the wrapper.
        def step(t, h_prev):
            h_new = jnp.tanh(
                seq_ref[t]
                + jnp.dot(h_prev, w_hh, preferred_element_type=jnp.float32)
            )
            if not last_layer:
                seq_ref[t] = h_new       # becomes next layer's input
            return h_new

        # T is small & static here -> full unroll; for large T prefer a
        # visible loop with unroll=4..8 to bound live ranges.
        h = lax.fori_loop(0, T, step, jnp.zeros((Bb, Hp), jnp.float32),
                          unroll=True)

    # Final FC on the top layer's last hidden state (== out[:, -1, :]).
    out_ref[...] = (
        jnp.dot(h, wfc_ref[...], preferred_element_type=jnp.float32)
        + bfc_ref[...]
    )


def _fused_rnn_call(x_pad, w_ih_all, w_hh_all, b_all, w_fc_t, b_fc):
    T, Bp, Ep = x_pad.shape
    L, _, Hp = w_hh_all.shape
    Op = w_fc_t.shape[1]
    nb = Bp // BLOCK_B                       # batch blocks (parallel axis)
    return pl.pallas_call(
        fused_rnn_kernel,
        out_shape=jax.ShapeDtypeStruct((Bp, Op), jnp.float32),
        grid_spec=pltpu.PrefetchScalarGridSpec(
            num_scalar_prefetch=0,
            grid=(nb,),
            in_specs=[
                pl.BlockSpec((T, BLOCK_B, Ep), lambda b: (0, b, 0)),
                pl.BlockSpec((L, Ep, Hp), lambda b: (0, 0, 0)),
                pl.BlockSpec((L, Hp, Hp), lambda b: (0, 0, 0)),
                pl.BlockSpec((L, 1, Hp), lambda b: (0, 0, 0)),
                pl.BlockSpec((Hp, Op), lambda b: (0, 0)),
                pl.BlockSpec((1, Op), lambda b: (0, 0)),
            ],
            out_specs=pl.BlockSpec((BLOCK_B, Op), lambda b: (b, 0)),
            scratch_shapes=[
                pltpu.VMEM((T, BLOCK_B, Hp), jnp.float32),  # layer sequence
            ],
        ),
        compiler_params=pltpu.CompilerParams(
            # Batch blocks are independent -> shard across v7x's 2 TCs.
            dimension_semantics=("parallel",),
            # Explicit, conservative VMEM budget (safe on v5e/v6e/v7x).
            vmem_limit_bytes=32 * 1024 * 1024,
        ),
    )(x_pad, w_ih_all, w_hh_all, b_all, w_fc_t, b_fc)


# ----------------------------------------------------------------------------
# Forward wrapper (embedding gather + padding glue in plain XLA)
# ----------------------------------------------------------------------------
@functools.partial(jax.jit, static_argnames=("output_size",))
def rnn_forward(x_tokens, params, *, output_size):
    """Equivalent of RNN.forward(x): emb -> multi-layer tanh RNN -> fc(last)."""
    B, T = x_tokens.shape
    Bp = _round_up(max(B, BLOCK_B), BLOCK_B)
    # Gather directly in time-major order: no separate transpose round trip.
    # TODO(synk): embedding gather could be fused into the kernel via
    # scalar-prefetched token ids + a pl.Element row-gather BlockSpec.
    x_tbe = jnp.take(params["emb"], x_tokens.T, axis=0)    # (T, B, Ep)
    x_pad = jnp.pad(x_tbe, ((0, 0), (0, Bp - B), (0, 0)))  # (T, Bp, Ep)

    out_pad = _fused_rnn_call(
        x_pad, params["w_ih_all"], params["w_hh_all"], params["b_all"],
        params["w_fc_t"], params["b_fc"],
    )                                                      # (Bp, Op)
    return out_pad[:B, :output_size]                       # (B, O)


# ----------------------------------------------------------------------------
# Deterministic parameter construction (mirrors the nn.Module __init__ shapes)
# ----------------------------------------------------------------------------
def make_params(key, vocab_size, emb_size, padding_idx, output_size,
                hidden_size, num_layers):
    Ep = _round_up(emb_size, LANE)
    Hp = _round_up(hidden_size, LANE)
    Op = _round_up(output_size, LANE)
    # Stacked per-layer W_ih layout requires padded emb == padded hidden;
    # other configs fail loudly rather than silently mis-indexing.
    assert Ep == Hp, "stacked per-layer W_ih requires padded emb == padded hidden"

    keys = jax.random.split(key, 1 + 4 * num_layers + 2)
    ki = iter(keys)

    # nn.Embedding: normal(0,1), padding_idx row zeroed; pad lanes to Ep.
    emb = jax.random.normal(next(ki), (vocab_size, emb_size), jnp.float32)
    emb = emb.at[padding_idx].set(0.0)
    emb_pad = jnp.zeros((vocab_size, Ep), jnp.float32).at[:, :emb_size].set(emb)

    bound = 1.0 / (hidden_size ** 0.5)
    w_ih_all = jnp.zeros((num_layers, Ep, Hp), jnp.float32)
    w_hh_all = jnp.zeros((num_layers, Hp, Hp), jnp.float32)
    b_all = jnp.zeros((num_layers, 1, Hp), jnp.float32)
    for l in range(num_layers):
        in_size = emb_size if l == 0 else hidden_size
        w_ih = jax.random.uniform(next(ki), (hidden_size, in_size),
                                  jnp.float32, -bound, bound)
        w_hh = jax.random.uniform(next(ki), (hidden_size, hidden_size),
                                  jnp.float32, -bound, bound)
        b_ih = jax.random.uniform(next(ki), (hidden_size,),
                                  jnp.float32, -bound, bound)
        b_hh = jax.random.uniform(next(ki), (hidden_size,),
                                  jnp.float32, -bound, bound)
        w_ih_all = w_ih_all.at[l, :in_size, :hidden_size].set(w_ih.T)
        w_hh_all = w_hh_all.at[l, :hidden_size, :hidden_size].set(w_hh.T)
        b_all = b_all.at[l, 0, :hidden_size].set(b_ih + b_hh)

    w_fc = jax.random.uniform(next(ki), (output_size, hidden_size),
                              jnp.float32, -bound, bound)
    b_fc = jax.random.uniform(next(ki), (output_size,),
                              jnp.float32, -bound, bound)
    w_fc_t = jnp.zeros((Hp, Op), jnp.float32).at[:hidden_size,
                                                 :output_size].set(w_fc.T)
    b_fc_p = jnp.zeros((1, Op), jnp.float32).at[0, :output_size].set(b_fc)

    return {
        "emb": emb_pad,
        "w_ih_all": w_ih_all,
        "w_hh_all": w_hh_all,
        "b_all": b_all,
        "w_fc_t": w_fc_t,
        "b_fc": b_fc_p,
    }


if __name__ == "__main__":
    # Small, module-consistent shapes
    VOCAB, EMB, PAD_IDX = 100, 32, 0
    OUTPUT, HIDDEN, NUM_LAYERS = 4, 32, 2
    B, T = 2, 8
    # TODO(synk): bidirectional=True and inter-layer dropout are not
    # implemented (matches nn.RNN defaults: bidirectional=False, dropout=0).

    key = jax.random.PRNGKey(0)
    k_params, k_x = jax.random.split(key)
    params = make_params(k_params, VOCAB, EMB, PAD_IDX, OUTPUT, HIDDEN,
                         NUM_LAYERS)
    x = jax.random.randint(k_x, (B, T), 0, VOCAB, dtype=jnp.int32)

    out = rnn_forward(x, params, output_size=OUTPUT)
    jax.block_until_ready(out)
    assert out.shape == (B, OUTPUT), out.shape
    print("KERNEL_OK")
</pallas_src>

<mosaic_0001>
module attributes {stable_mosaic.version = 11 : i64} {
  func.func @fused_rnn_kernel(%arg0: i32, %arg1: memref<8x8x128xf32, #tpu.memory_space<vmem>>, %arg2: memref<2x128x128xf32, #tpu.memory_space<vmem>>, %arg3: memref<2x128x128xf32, #tpu.memory_space<vmem>>, %arg4: memref<2x1x128xf32, #tpu.memory_space<vmem>>, %arg5: memref<128x128xf32, #tpu.memory_space<vmem>>, %arg6: memref<1x128xf32, #tpu.memory_space<vmem>>, %arg7: memref<8x128xf32, #tpu.memory_space<vmem>>, %arg8: memref<8x8x128xf32, #tpu.memory_space<vmem>>) attributes {dimension_semantics = [#tpu.dimension_semantics<parallel>], iteration_bounds = array<i64: 1>, scalar_prefetch = 0 : i64, scratch_operands = 1 : i64, tpu.core_type = #tpu.core_type<tc>, window_params = [{transform_indices = @transform_0, window_bounds = array<i64: 8, 8, 128>}, {pipeline_mode = #tpu.pipeline_mode<synchronous>, transform_indices = @transform_1, window_bounds = array<i64: 2, 128, 128>}, {pipeline_mode = #tpu.pipeline_mode<synchronous>, transform_indices = @transform_2, window_bounds = array<i64: 2, 128, 128>}, {pipeline_mode = #tpu.pipeline_mode<synchronous>, transform_indices = @transform_3, window_bounds = array<i64: 2, 1, 128>}, {pipeline_mode = #tpu.pipeline_mode<synchronous>, transform_indices = @transform_4, window_bounds = array<i64: 128, 128>}, {pipeline_mode = #tpu.pipeline_mode<synchronous>, transform_indices = @transform_5, window_bounds = array<i64: 1, 128>}, {transform_indices = @transform_6, window_bounds = array<i64: 8, 128>}]} {
    %c0 = arith.constant 0 : index
    %c0_0 = arith.constant 0 : index
    %c0_1 = arith.constant 0 : index
    %0 = vector.load %arg1[%c0, %c0_0, %c0_1] : memref<8x8x128xf32, #tpu.memory_space<vmem>>, vector<8x8x128xf32>
    %1 = vector.shape_cast %0 : vector<8x8x128xf32> to vector<64x128xf32>
    %c0_2 = arith.constant 0 : index
    %c0_3 = arith.constant 0 : index
    %c0_4 = arith.constant 0 : index
    %2 = vector.load %arg2[%c0_2, %c0_3, %c0_4] : memref<2x128x128xf32, #tpu.memory_space<vmem>>, vector<1x128x128xf32>
    %3 = vector.shape_cast %2 : vector<1x128x128xf32> to vector<128x128xf32>
    %cst = arith.constant dense<0.000000e+00> : vector<64x128xf32>
    %4 = tpu.matmul %1, %3, %cst {dimension_numbers = #tpu.dot_dimension_numbers<[1], [0], [0], [1], [0, 0, 1, 1], [], []>} : vector<64x128xf32>, vector<128x128xf32>, vector<64x128xf32> -> vector<64x128xf32>
    %c0_5 = arith.constant 0 : index
    %c0_6 = arith.constant 0 : index
    %c0_7 = arith.constant 0 : index
    %5 = vector.load %arg4[%c0_5, %c0_6, %c0_7] : memref<2x1x128xf32, #tpu.memory_space<vmem>>, vector<1x1x128xf32>
    %6 = vector.shape_cast %5 : vector<1x1x128xf32> to vector<1x128xf32>
    %7 = vector.broadcast %6 : vector<1x128xf32> to vector<64x128xf32>
    %8 = arith.addf %4, %7 : vector<64x128xf32>
    %9 = vector.shape_cast %8 : vector<64x128xf32> to vector<8x8x128xf32>
    %c0_8 = arith.constant 0 : index
    %c0_9 = arith.constant 0 : index
    %c0_10 = arith.constant 0 : index
    %10 = vector.load %arg8[%c0_8, %c0_9, %c0_10] : memref<8x8x128xf32, #tpu.memory_space<vmem>>, vector<8x8x128xf32>
    tpu.vector_store %arg8[%c0_8, %c0_9, %c0_10], %9 {strides = array<i32>} : memref<8x8x128xf32, #tpu.memory_space<vmem>>, vector<8x8x128xf32>,
    %c0_11 = arith.constant 0 : index
    %c0_12 = arith.constant 0 : index
    %c0_13 = arith.constant 0 : index
    %11 = vector.load %arg3[%c0_11, %c0_12, %c0_13] : memref<2x128x128xf32, #tpu.memory_space<vmem>>, vector<1x128x128xf32>
    %12 = vector.shape_cast %11 : vector<1x128x128xf32> to vector<128x128xf32>
    %cst_14 = arith.constant 0.000000e+00 : f32
    %13 = vector.broadcast %cst_14 : f32 to vector<8x128xf32>
    %c0_i32 = arith.constant 0 : i32
    %14 = arith.index_cast %c0_i32 : i32 to index
    %c0_15 = arith.constant 0 : index
    %c0_16 = arith.constant 0 : index
    %15 = vector.load %arg8[%14, %c0_15, %c0_16] : memref<8x8x128xf32, #tpu.memory_space<vmem>>, vector<1x8x128xf32>
    %16 = vector.shape_cast %15 : vector<1x8x128xf32> to vector<8x128xf32>
    %cst_17 = arith.constant dense<0.000000e+00> : vector<8x128xf32>
    %17 = tpu.matmul %13, %12, %cst_17 {dimension_numbers = #tpu.dot_dimension_numbers<[1], [0], [0], [1], [0, 0, 1, 1], [], []>} : vector<8x128xf32>, vector<128x128xf32>, vector<8x128xf32> -> vector<8x128xf32>
    %18 = arith.addf %16, %17 : vector<8x128xf32>
    %19 = math.tanh %18 : vector<8x128xf32>
    %20 = arith.index_cast %c0_i32 : i32 to index
    %c0_18 = arith.constant 0 : index
    %c0_19 = arith.constant 0 : index
    %21 = vector.load %arg8[%20, %c0_18, %c0_19] : memref<8x8x128xf32, #tpu.memory_space<vmem>>, vector<1x8x128xf32>
    %22 = vector.shape_cast %21 : vector<1x8x128xf32> to vector<8x128xf32>
    %23 = vector.shape_cast %19 : vector<8x128xf32> to vector<1x8x128xf32>
    tpu.vector_store %arg8[%20, %c0_18, %c0_19], %23 {strides = array<i32>} : memref<8x8x128xf32, #tpu.memory_space<vmem>>, vector<1x8x128xf32>,
    %c1_i32 = arith.constant 1 : i32
    %24 = arith.index_cast %c1_i32 : i32 to index
    %c0_20 = arith.constant 0 : index
    %c0_21 = arith.constant 0 : index
    %25 = vector.load %arg8[%24, %c0_20, %c0_21] : memref<8x8x128xf32, #tpu.memory_space<vmem>>, vector<1x8x128xf32>
    %26 = vector.shape_cast %25 : vector<1x8x128xf32> to vector<8x128xf32>
    %cst_22 = arith.constant dense<0.000000e+00> : vector<8x128xf32>
    %27 = tpu.matmul %19, %12, %cst_22 {dimension_numbers = #tpu.dot_dimension_numbers<[1], [0], [0], [1], [0, 0, 1, 1], [], []>} : vector<8x128xf32>, vector<128x128xf32>, vector<8x128xf32> -> vector<8x128xf32>
    %28 = arith.addf %26, %27 : vector<8x128xf32>
    %29 = math.tanh %28 : vector<8x128xf32>
    %30 = arith.index_cast %c1_i32 : i32 to index
    %c0_23 = arith.constant 0 : index
    %c0_24 = arith.constant 0 : index
    %31 = vector.load %arg8[%30, %c0_23, %c0_24] : memref<8x8x128xf32, #tpu.memory_space<vmem>>, vector<1x8x128xf32>
    %32 = vector.shape_cast %31 : vector<1x8x128xf32> to vector<8x128xf32>
    %33 = vector.shape_cast %29 : vector<8x128xf32> to vector<1x8x128xf32>
    tpu.vector_store %arg8[%30, %c0_23, %c0_24], %33 {strides = array<i32>} : memref<8x8x128xf32, #tpu.memory_space<vmem>>, vector<1x8x128xf32>,
    %c2_i32 = arith.constant 2 : i32
    %34 = arith.index_cast %c2_i32 : i32 to index
    %c0_25 = arith.constant 0 : index
    %c0_26 = arith.constant 0 : index
    %35 = vector.load %arg8[%34, %c0_25, %c0_26] : memref<8x8x128xf32, #tpu.memory_space<vmem>>, vector<1x8x128xf32>
    %36 = vector.shape_cast %35 : vector<1x8x128xf32> to vector<8x128xf32>
    %cst_27 = arith.constant dense<0.000000e+00> : vector<8x128xf32>
    %37 = tpu.matmul %29, %12, %cst_27 {dimension_numbers = #tpu.dot_dimension_numbers<[1], [0], [0], [1], [0, 0, 1, 1], [], []>} : vector<8x128xf32>, vector<128x128xf32>, vector<8x128xf32> -> vector<8x128xf32>
    %38 = arith.addf %36, %37 : vector<8x128xf32>
    %39 = math.tanh %38 : vector<8x128xf32>
    %40 = arith.index_cast %c2_i32 : i32 to index
    %c0_28 = arith.constant 0 : index
    %c0_29 = arith.constant 0 : index
    %41 = vector.load %arg8[%40, %c0_28, %c0_29] : memref<8x8x128xf32, #tpu.memory_space<vmem>>, vector<1x8x128xf32>
    %42 = vector.shape_cast %41 : vector<1x8x128xf32> to vector<8x128xf32>
    %43 = vector.shape_cast %39 : vector<8x128xf32> to vector<1x8x128xf32>
    tpu.vector_store %arg8[%40, %c0_28, %c0_29], %43 {strides = array<i32>} : memref<8x8x128xf32, #tpu.memory_space<vmem>>, vector<1x8x128xf32>,
    %c3_i32 = arith.constant 3 : i32
    %44 = arith.index_cast %c3_i32 : i32 to index
    %c0_30 = arith.constant 0 : index
    %c0_31 = arith.constant 0 : index
    %45 = vector.load %arg8[%44, %c0_30, %c0_31] : memref<8x8x128xf32, #tpu.memory_space<vmem>>, vector<1x8x128xf32>
    %46 = vector.shape_cast %45 : vector<1x8x128xf32> to vector<8x128xf32>
    %cst_32 = arith.constant dense<0.000000e+00> : vector<8x128xf32>
    %47 = tpu.matmul %39, %12, %cst_32 {dimension_numbers = #tpu.dot_dimension_numbers<[1], [0], [0], [1], [0, 0, 1, 1], [], []>} : vector<8x128xf32>, vector<128x128xf32>, vector<8x128xf32> -> vector<8x128xf32>
    %48 = arith.addf %46, %47 : vector<8x128xf32>
    %49 = math.tanh %48 : vector<8x128xf32>
    %50 = arith.index_cast %c3_i32 : i32 to index
    %c0_33 = arith.constant 0 : index
    %c0_34 = arith.constant 0 : index
    %51 = vector.load %arg8[%50, %c0_33, %c0_34] : memref<8x8x128xf32, #tpu.memory_space<vmem>>, vector<1x8x128xf32>
    %52 = vector.shape_cast %51 : vector<1x8x128xf32> to vector<8x128xf32>
    %53 = vector.shape_cast %49 : vector<8x128xf32> to vector<1x8x128xf32>
    tpu.vector_store %arg8[%50, %c0_33, %c0_34], %53 {strides = array<i32>} : memref<8x8x128xf32, #tpu.memory_space<vmem>>, vector<1x8x128xf32>,
    %c4_i32 = arith.constant 4 : i32
    %54 = arith.index_cast %c4_i32 : i32 to index
    %c0_35 = arith.constant 0 : index
    %c0_36 = arith.constant 0 : index
    %55 = vector.load %arg8[%54, %c0_35, %c0_36] : memref<8x8x128xf32, #tpu.memory_space<vmem>>, vector<1x8x128xf32>
    %56 = vector.shape_cast %55 : vector<1x8x128xf32> to vector<8x128xf32>
    %cst_37 = arith.constant dense<0.000000e+00> : vector<8x128xf32>
    %57 = tpu.matmul %49, %12, %cst_37 {dimension_numbers = #tpu.dot_dimension_numbers<[1], [0], [0], [1], [0, 0, 1, 1], [], []>} : vector<8x128xf32>, vector<128x128xf32>, vector<8x128xf32> -> vector<8x128xf32>
    %58 = arith.addf %56, %57 : vector<8x128xf32>
    %59 = math.tanh %58 : vector<8x128xf32>
    %60 = arith.index_cast %c4_i32 : i32 to index
    %c0_38 = arith.constant 0 : index
    %c0_39 = arith.constant 0 : index
    %61 = vector.load %arg8[%60, %c0_38, %c0_39] : memref<8x8x128xf32, #tpu.memory_space<vmem>>, vector<1x8x128xf32>
    %62 = vector.shape_cast %61 : vector<1x8x128xf32> to vector<8x128xf32>
    %63 = vector.shape_cast %59 : vector<8x128xf32> to vector<1x8x128xf32>
    tpu.vector_store %arg8[%60, %c0_38, %c0_39], %63 {strides = array<i32>} : memref<8x8x128xf32, #tpu.memory_space<vmem>>, vector<1x8x128xf32>,
    %c5_i32 = arith.constant 5 : i32
    %64 = arith.index_cast %c5_i32 : i32 to index
    %c0_40 = arith.constant 0 : index
    %c0_41 = arith.constant 0 : index
    %65 = vector.load %arg8[%64, %c0_40, %c0_41] : memref<8x8x128xf32, #tpu.memory_space<vmem>>, vector<1x8x128xf32>
    %66 = vector.shape_cast %65 : vector<1x8x128xf32> to vector<8x128xf32>
    %cst_42 = arith.constant dense<0.000000e+00> : vector<8x128xf32>
    %67 = tpu.matmul %59, %12, %cst_42 {dimension_numbers = #tpu.dot_dimension_numbers<[1], [0], [0], [1], [0, 0, 1, 1], [], []>} : vector<8x128xf32>, vector<128x128xf32>, vector<8x128xf32> -> vector<8x128xf32>
    %68 = arith.addf %66, %67 : vector<8x128xf32>
    %69 = math.tanh %68 : vector<8x128xf32>
    %70 = arith.index_cast %c5_i32 : i32 to index
    %c0_43 = arith.constant 0 : index
    %c0_44 = arith.constant 0 : index
    %71 = vector.load %arg8[%70, %c0_43, %c0_44] : memref<8x8x128xf32, #tpu.memory_space<vmem>>, vector<1x8x128xf32>
    %72 = vector.shape_cast %71 : vector<1x8x128xf32> to vector<8x128xf32>
    %73 = vector.shape_cast %69 : vector<8x128xf32> to vector<1x8x128xf32>
    tpu.vector_store %arg8[%70, %c0_43, %c0_44], %73 {strides = array<i32>} : memref<8x8x128xf32, #tpu.memory_space<vmem>>, vector<1x8x128xf32>,
    %c6_i32 = arith.constant 6 : i32
    %74 = arith.index_cast %c6_i32 : i32 to index
    %c0_45 = arith.constant 0 : index
    %c0_46 = arith.constant 0 : index
    %75 = vector.load %arg8[%74, %c0_45, %c0_46] : memref<8x8x128xf32, #tpu.memory_space<vmem>>, vector<1x8x128xf32>
    %76 = vector.shape_cast %75 : vector<1x8x128xf32> to vector<8x128xf32>
    %cst_47 = arith.constant dense<0.000000e+00> : vector<8x128xf32>
    %77 = tpu.matmul %69, %12, %cst_47 {dimension_numbers = #tpu.dot_dimension_numbers<[1], [0], [0], [1], [0, 0, 1, 1], [], []>} : vector<8x128xf32>, vector<128x128xf32>, vector<8x128xf32> -> vector<8x128xf32>
    %78 = arith.addf %76, %77 : vector<8x128xf32>
    %79 = math.tanh %78 : vector<8x128xf32>
    %80 = arith.index_cast %c6_i32 : i32 to index
    %c0_48 = arith.constant 0 : index
    %c0_49 = arith.constant 0 : index
    %81 = vector.load %arg8[%80, %c0_48, %c0_49] : memref<8x8x128xf32, #tpu.memory_space<vmem>>, vector<1x8x128xf32>
    %82 = vector.shape_cast %81 : vector<1x8x128xf32> to vector<8x128xf32>
    %83 = vector.shape_cast %79 : vector<8x128xf32> to vector<1x8x128xf32>
    tpu.vector_store %arg8[%80, %c0_48, %c0_49], %83 {strides = array<i32>} : memref<8x8x128xf32, #tpu.memory_space<vmem>>, vector<1x8x128xf32>,
    %c7_i32 = arith.constant 7 : i32
    %84 = arith.index_cast %c7_i32 : i32 to index
    %c0_50 = arith.constant 0 : index
    %c0_51 = arith.constant 0 : index
    %85 = vector.load %arg8[%84, %c0_50, %c0_51] : memref<8x8x128xf32, #tpu.memory_space<vmem>>, vector<1x8x128xf32>
    %86 = vector.shape_cast %85 : vector<1x8x128xf32> to vector<8x128xf32>
    %cst_52 = arith.constant dense<0.000000e+00> : vector<8x128xf32>
    %87 = tpu.matmul %79, %12, %cst_52 {dimension_numbers = #tpu.dot_dimension_numbers<[1], [0], [0], [1], [0, 0, 1, 1], [], []>} : vector<8x128xf32>, vector<128x128xf32>, vector<8x128xf32> -> vector<8x128xf32>
    %88 = arith.addf %86, %87 : vector<8x128xf32>
    %89 = math.tanh %88 : vector<8x128xf32>
    %90 = arith.index_cast %c7_i32 : i32 to index
    %c0_53 = arith.constant 0 : index
    %c0_54 = arith.constant 0 : index
    %91 = vector.load %arg8[%90, %c0_53, %c0_54] : memref<8x8x128xf32, #tpu.memory_space<vmem>>, vector<1x8x128xf32>
    %92 = vector.shape_cast %91 : vector<1x8x128xf32> to vector<8x128xf32>
    %93 = vector.shape_cast %89 : vector<8x128xf32> to vector<1x8x128xf32>
    tpu.vector_store %arg8[%90, %c0_53, %c0_54], %93 {strides = array<i32>} : memref<8x8x128xf32, #tpu.memory_space<vmem>>, vector<1x8x128xf32>,
    %c8_i32 = arith.constant 8 : i32
    %c0_55 = arith.constant 0 : index
    %c0_56 = arith.constant 0 : index
    %c0_57 = arith.constant 0 : index
    %94 = vector.load %arg8[%c0_55, %c0_56, %c0_57] : memref<8x8x128xf32, #tpu.memory_space<vmem>>, vector<8x8x128xf32>
    %95 = vector.shape_cast %94 : vector<8x8x128xf32> to vector<64x128xf32>
    %c1 = arith.constant 1 : index
    %c0_58 = arith.constant 0 : index
    %c0_59 = arith.constant 0 : index
    %96 = vector.load %arg2[%c1, %c0_58, %c0_59] : memref<2x128x128xf32, #tpu.memory_space<vmem>>, vector<1x128x128xf32>
    %97 = vector.shape_cast %96 : vector<1x128x128xf32> to vector<128x128xf32>
    %cst_60 = arith.constant dense<0.000000e+00> : vector<64x128xf32>
    %98 = tpu.matmul %95, %97, %cst_60 {dimension_numbers = #tpu.dot_dimension_numbers<[1], [0], [0], [1], [0, 0, 1, 1], [], []>} : vector<64x128xf32>, vector<128x128xf32>, vector<64x128xf32> -> vector<64x128xf32>
    %c1_61 = arith.constant 1 : index
    %c0_62 = arith.constant 0 : index
    %c0_63 = arith.constant 0 : index
    %99 = vector.load %arg4[%c1_61, %c0_62, %c0_63] : memref<2x1x128xf32, #tpu.memory_space<vmem>>, vector<1x1x128xf32>
    %100 = vector.shape_cast %99 : vector<1x1x128xf32> to vector<1x128xf32>
    %101 = vector.broadcast %100 : vector<1x128xf32> to vector<64x128xf32>
    %102 = arith.addf %98, %101 : vector<64x128xf32>
    %103 = vector.shape_cast %102 : vector<64x128xf32> to vector<8x8x128xf32>
    %c0_64 = arith.constant 0 : index
    %c0_65 = arith.constant 0 : index
    %c0_66 = arith.constant 0 : index
    %104 = vector.load %arg8[%c0_64, %c0_65, %c0_66] : memref<8x8x128xf32, #tpu.memory_space<vmem>>, vector<8x8x128xf32>
    tpu.vector_store %arg8[%c0_64, %c0_65, %c0_66], %103 {strides = array<i32>} : memref<8x8x128xf32, #tpu.memory_space<vmem>>, vector<8x8x128xf32>,
    %c1_67 = arith.constant 1 : index
    %c0_68 = arith.constant 0 : index
    %c0_69 = arith.constant 0 : index
    %105 = vector.load %arg3[%c1_67, %c0_68, %c0_69] : memref<2x128x128xf32, #tpu.memory_space<vmem>>, vector<1x128x128xf32>
    %106 = vector.shape_cast %105 : vector<1x128x128xf32> to vector<128x128xf32>
    %cst_70 = arith.constant 0.000000e+00 : f32
    %107 = vector.broadcast %cst_70 : f32 to vector<8x128xf32>
    %c0_i32_71 = arith.constant 0 : i32
    %108 = arith.index_cast %c0_i32_71 : i32 to index
    %c0_72 = arith.constant 0 : index
    %c0_73 = arith.constant 0 : index
    %109 = vector.load %arg8[%108, %c0_72, %c0_73] : memref<8x8x128xf32, #tpu.memory_space<vmem>>, vector<1x8x128xf32>
    %110 = vector.shape_cast %109 : vector<1x8x128xf32> to vector<8x128xf32>
    %cst_74 = arith.constant dense<0.000000e+00> : vector<8x128xf32>
    %111 = tpu.matmul %107, %106, %cst_74 {dimension_numbers = #tpu.dot_dimension_numbers<[1], [0], [0], [1], [0, 0, 1, 1], [], []>} : vector<8x128xf32>, vector<128x128xf32>, vector<8x128xf32> -> vector<8x128xf32>
    %112 = arith.addf %110, %111 : vector<8x128xf32>
    %113 = math.tanh %112 : vector<8x128xf32>
    %c1_i32_75 = arith.constant 1 : i32
    %114 = arith.index_cast %c1_i32_75 : i32 to index
    %c0_76 = arith.constant 0 : index
    %c0_77 = arith.constant 0 : index
    %115 = vector.load %arg8[%114, %c0_76, %c0_77] : memref<8x8x128xf32, #tpu.memory_space<vmem>>, vector<1x8x128xf32>
    %116 = vector.shape_cast %115 : vector<1x8x128xf32> to vector<8x128xf32>
    %cst_78 = arith.constant dense<0.000000e+00> : vector<8x128xf32>
    %117 = tpu.matmul %113, %106, %cst_78 {dimension_numbers = #tpu.dot_dimension_numbers<[1], [0], [0], [1], [0, 0, 1, 1], [], []>} : vector<8x128xf32>, vector<128x128xf32>, vector<8x128xf32> -> vector<8x128xf32>
    %118 = arith.addf %116, %117 : vector<8x128xf32>
    %119 = math.tanh %118 : vector<8x128xf32>
    %c2_i32_79 = arith.constant 2 : i32
    %120 = arith.index_cast %c2_i32_79 : i32 to index
    %c0_80 = arith.constant 0 : index
    %c0_81 = arith.constant 0 : index
    %121 = vector.load %arg8[%120, %c0_80, %c0_81] : memref<8x8x128xf32, #tpu.memory_space<vmem>>, vector<1x8x128xf32>
    %122 = vector.shape_cast %121 : vector<1x8x128xf32> to vector<8x128xf32>
    %cst_82 = arith.constant dense<0.000000e+00> : vector<8x128xf32>
    %123 = tpu.matmul %119, %106, %cst_82 {dimension_numbers = #tpu.dot_dimension_numbers<[1], [0], [0], [1], [0, 0, 1, 1], [], []>} : vector<8x128xf32>, vector<128x128xf32>, vector<8x128xf32> -> vector<8x128xf32>
    %124 = arith.addf %122, %123 : vector<8x128xf32>
    %125 = math.tanh %124 : vector<8x128xf32>
    %c3_i32_83 = arith.constant 3 : i32
    %126 = arith.index_cast %c3_i32_83 : i32 to index
    %c0_84 = arith.constant 0 : index
    %c0_85 = arith.constant 0 : index
    %127 = vector.load %arg8[%126, %c0_84, %c0_85] : memref<8x8x128xf32, #tpu.memory_space<vmem>>, vector<1x8x128xf32>
    %128 = vector.shape_cast %127 : vector<1x8x128xf32> to vector<8x128xf32>
    %cst_86 = arith.constant dense<0.000000e+00> : vector<8x128xf32>
    %129 = tpu.matmul %125, %106, %cst_86 {dimension_numbers = #tpu.dot_dimension_numbers<[1], [0], [0], [1], [0, 0, 1, 1], [], []>} : vector<8x128xf32>, vector<128x128xf32>, vector<8x128xf32> -> vector<8x128xf32>
    %130 = arith.addf %128, %129 : vector<8x128xf32>
    %131 = math.tanh %130 : vector<8x128xf32>
    %c4_i32_87 = arith.constant 4 : i32
    %132 = arith.index_cast %c4_i32_87 : i32 to index
    %c0_88 = arith.constant 0 : index
    %c0_89 = arith.constant 0 : index
    %133 = vector.load %arg8[%132, %c0_88, %c0_89] : memref<8x8x128xf32, #tpu.memory_space<vmem>>, vector<1x8x128xf32>
    %134 = vector.shape_cast %133 : vector<1x8x128xf32> to vector<8x128xf32>
    %cst_90 = arith.constant dense<0.000000e+00> : vector<8x128xf32>
    %135 = tpu.matmul %131, %106, %cst_90 {dimension_numbers = #tpu.dot_dimension_numbers<[1], [0], [0], [1], [0, 0, 1, 1], [], []>} : vector<8x128xf32>, vector<128x128xf32>, vector<8x128xf32> -> vector<8x128xf32>
    %136 = arith.addf %134, %135 : vector<8x128xf32>
    %137 = math.tanh %136 : vector<8x128xf32>
    %c5_i32_91 = arith.constant 5 : i32
    %138 = arith.index_cast %c5_i32_91 : i32 to index
    %c0_92 = arith.constant 0 : index
    %c0_93 = arith.constant 0 : index
    %139 = vector.load %arg8[%138, %c0_92, %c0_93] : memref<8x8x128xf32, #tpu.memory_space<vmem>>, vector<1x8x128xf32>
    %140 = vector.shape_cast %139 : vector<1x8x128xf32> to vector<8x128xf32>
    %cst_94 = arith.constant dense<0.000000e+00> : vector<8x128xf32>
    %141 = tpu.matmul %137, %106, %cst_94 {dimension_numbers = #tpu.dot_dimension_numbers<[1], [0], [0], [1], [0, 0, 1, 1], [], []>} : vector<8x128xf32>, vector<128x128xf32>, vector<8x128xf32> -> vector<8x128xf32>
    %142 = arith.addf %140, %141 : vector<8x128xf32>
    %143 = math.tanh %142 : vector<8x128xf32>
    %c6_i32_95 = arith.constant 6 : i32
    %144 = arith.index_cast %c6_i32_95 : i32 to index
    %c0_96 = arith.constant 0 : index
    %c0_97 = arith.constant 0 : index
    %145 = vector.load %arg8[%144, %c0_96, %c0_97] : memref<8x8x128xf32, #tpu.memory_space<vmem>>, vector<1x8x128xf32>
    %146 = vector.shape_cast %145 : vector<1x8x128xf32> to vector<8x128xf32>
    %cst_98 = arith.constant dense<0.000000e+00> : vector<8x128xf32>
    %147 = tpu.matmul %143, %106, %cst_98 {dimension_numbers = #tpu.dot_dimension_numbers<[1], [0], [0], [1], [0, 0, 1, 1], [], []>} : vector<8x128xf32>, vector<128x128xf32>, vector<8x128xf32> -> vector<8x128xf32>
    %148 = arith.addf %146, %147 : vector<8x128xf32>
    %149 = math.tanh %148 : vector<8x128xf32>
    %c7_i32_99 = arith.constant 7 : i32
    %150 = arith.index_cast %c7_i32_99 : i32 to index
    %c0_100 = arith.constant 0 : index
    %c0_101 = arith.constant 0 : index
    %151 = vector.load %arg8[%150, %c0_100, %c0_101] : memref<8x8x128xf32, #tpu.memory_space<vmem>>, vector<1x8x128xf32>
    %152 = vector.shape_cast %151 : vector<1x8x128xf32> to vector<8x128xf32>
    %cst_102 = arith.constant dense<0.000000e+00> : vector<8x128xf32>
    %153 = tpu.matmul %149, %106, %cst_102 {dimension_numbers = #tpu.dot_dimension_numbers<[1], [0], [0], [1], [0, 0, 1, 1], [], []>} : vector<8x128xf32>, vector<128x128xf32>, vector<8x128xf32> -> vector<8x128xf32>
    %154 = arith.addf %152, %153 : vector<8x128xf32>
    %155 = math.tanh %154 : vector<8x128xf32>
    %c8_i32_103 = arith.constant 8 : i32
    %c0_104 = arith.constant 0 : index
    %c0_105 = arith.constant 0 : index
    %156 = vector.load %arg5[%c0_104, %c0_105] : memref<128x128xf32, #tpu.memory_space<vmem>>, vector<128x128xf32>
    %cst_106 = arith.constant dense<0.000000e+00> : vector<8x128xf32>
    %157 = tpu.matmul %155, %156, %cst_106 {dimension_numbers = #tpu.dot_dimension_numbers<[1], [0], [0], [1], [0, 0, 1, 1], [], []>} : vector<8x128xf32>, vector<128x128xf32>, vector<8x128xf32> -> vector<8x128xf32>
    %c0_107 = arith.constant 0 : index
    %c0_108 = arith.constant 0 : index
    %158 = vector.load %arg6[%c0_107, %c0_108] : memref<1x128xf32, #tpu.memory_space<vmem>>, vector<1x128xf32>
    %159 = vector.broadcast %158 : vector<1x128xf32> to vector<8x128xf32>
    %160 = arith.addf %157, %159 : vector<8x128xf32>
    %c0_109 = arith.constant 0 : index
    %c0_110 = arith.constant 0 : index
    %161 = vector.load %arg7[%c0_109, %c0_110] : memref<8x128xf32, #tpu.memory_space<vmem>>, vector<8x128xf32>
    tpu.vector_store %arg7[%c0_109, %c0_110], %160 {strides = array<i32>} : memref<8x128xf32, #tpu.memory_space<vmem>>, vector<8x128xf32>,
    return
  }
  func.func @transform_0(%arg0: i32) -> (i32, i32, i32) {
    %c0_i32 = arith.constant 0 : i32
    %c0_i32_0 = arith.constant 0 : i32
    %c0_i32_1 = arith.constant 0 : i32
    return %c0_i32, %arg0, %c0_i32_0 : i32, i32, i32
  }
  func.func @transform_1(%arg0: i32) -> (i32, i32, i32) {
    %c0_i32 = arith.constant 0 : i32
    %c0_i32_0 = arith.constant 0 : i32
    %c0_i32_1 = arith.constant 0 : i32
    %c0_i32_2 = arith.constant 0 : i32
    return %c0_i32, %c0_i32_0, %c0_i32_1 : i32, i32, i32
  }
  func.func @transform_2(%arg0: i32) -> (i32, i32, i32) {
    %c0_i32 = arith.constant 0 : i32
    %c0_i32_0 = arith.constant 0 : i32
    %c0_i32_1 = arith.constant 0 : i32
    %c0_i32_2 = arith.constant 0 : i32
    return %c0_i32, %c0_i32_0, %c0_i32_1 : i32, i32, i32
  }
  func.func @transform_3(%arg0: i32) -> (i32, i32, i32) {
    %c0_i32 = arith.constant 0 : i32
    %c0_i32_0 = arith.constant 0 : i32
    %c0_i32_1 = arith.constant 0 : i32
    %c0_i32_2 = arith.constant 0 : i32
    return %c0_i32, %c0_i32_0, %c0_i32_1 : i32, i32, i32
  }
  func.func @transform_4(%arg0: i32) -> (i32, i32) {
    %c0_i32 = arith.constant 0 : i32
    %c0_i32_0 = arith.constant 0 : i32
    %c0_i32_1 = arith.constant 0 : i32
    return %c0_i32, %c0_i32_0 : i32, i32
  }
  func.func @transform_5(%arg0: i32) -> (i32, i32) {
    %c0_i32 = arith.constant 0 : i32
    %c0_i32_0 = arith.constant 0 : i32
    %c0_i32_1 = arith.constant 0 : i32
    return %c0_i32, %c0_i32_0 : i32, i32
  }
  func.func @transform_6(%arg0: i32) -> (i32, i32) {
    %c0_i32 = arith.constant 0 : i32
    %c0_i32_0 = arith.constant 0 : i32
    return %arg0, %c0_i32 : i32, i32
  }
}

</mosaic_0001>

<bundles_post_ra>
// kernel: rnn_forward.1
= control target key start
LH: loop header
LB: loop body
LE: loop exit
PB: predicated region body
PF: predicated region fallthrough
CT: control target
= control target key end

     0   :  { %11 = vsyncpa [#allocation4], 0  ;;  %s3859_s0 = inlined_call_operand.vmem [shape: f32[8,8,128], index: 0, kind: input, shape index: {}]   ;;  %s3860_s1 = inlined_call_operand.vmem [shape: f32[2,128,128], index: 1, kind: input, shape index: {}]   ;;  %s3861_s2 = inlined_call_operand.hbm [shape: f32[2,128,128], index: 2, kind: input, shape index: {}]   ;;  %s3862_s3 = inlined_call_operand.vmem [shape: f32[2,1,128], index: 3, kind: input, shape index: {}]   ;;  %s3863_s4 = inlined_call_operand.hbm [shape: f32[128,128], index: 4, kind: input, shape index: {}]   ;;  %s3864_s5 = inlined_call_operand.vmem [shape: f32[1,128], index: 5, kind: input, shape index: {}]   ;;  %s3865_s6 = inlined_call_operand.vmem [shape: f32[8,128], index: 6, kind: output, shape index: {}]  }
   0x1   :  { %12 = vsyncpa [#allocation6], 0  ;;  %s3256_s21 = smov [#allocation3]   ;;  %s3208_s25 = scalar_lea.hbm %s3861_s2, 4096 }
   0x2   :  { %s22_s22 = sshll.u32 %s3256_s21, 4  ;;  %p3209_p0 = scmp.ne.s32.totalorder %s3861_s2, %s3208_s25  ;;  %s23_s22 = int_to_ptr.vmem [resolvable:$true] %s22_s22 }
   0x3   :  { %p3212_p1 = scmp.lt.u32.totalorder %s3208_s25, %s3861_s2 }
   0x5   :  { %p3214_p2 = pnand %p3212_p1, %p3209_p0 }
   0x7   :  { %3217 = shalt.err (!%p3214_p2)
}
   0x8   :  { %s3218_s30 = scalar_lea.vmem %s23_s22, 4096  ;;  %p3223_p4 = scmp.lt.s32.totalorder %s23_s22, %s23_s22 }
   0x9   :  { %p3219_p3 = scmp.ne.s32.totalorder %s23_s22, %s3218_s30  ;;  %p3224_p5 = scmp.lt.s32.totalorder %s3218_s30, %s3218_s30 }
   0xb   :  { %p3225_p6 = por %p3224_p5, %p3223_p4 }
   0xd   :  { %p3226_p7 = pnand %p3225_p6, %p3219_p3 }
   0xf   :  { %3229 = shalt.err (!%p3226_p7)
}
  0x10   :  { %s3257_s7 = smov 128   ;;  %s3258_s8 = smov 8  }
  0x11   :  { %28 = dma.hbm_to_vmem [thread:$0]  %s3861_s2, 4096, %s23_s22, [#allocation4], %s3257_s7, %s3257_s7, %s3258_s8  }
  0x12   :  { %s3259_s11 = smov [#allocation5]   ;;  %s3230_s15 = scalar_lea.hbm %s3863_s4, 2048 }
  0x13   :  { %s36_s12 = sshll.u32 %s3259_s11, 4  ;;  %p3231_p8 = scmp.ne.s32.totalorder %s3863_s4, %s3230_s15  ;;  %s37_s12 = int_to_ptr.vmem [resolvable:$true] %s36_s12 }
  0x14   :  { %p3234_p9 = scmp.lt.u32.totalorder %s3230_s15, %s3863_s4 }
  0x16   :  { %p3236_p10 = pnand %p3234_p9, %p3231_p8 }
  0x18   :  { %3239 = shalt.err (!%p3236_p10)
}
  0x19   :  { %s3240_s20 = scalar_lea.vmem %s37_s12, 2048  ;;  %p3245_p12 = scmp.lt.s32.totalorder %s37_s12, %s37_s12 }
  0x1a   :  { %p3241_p11 = scmp.ne.s32.totalorder %s37_s12, %s3240_s20  ;;  %p3246_p13 = scmp.lt.s32.totalorder %s3240_s20, %s3240_s20 }
  0x1c   :  { %p3247_p0 = por %p3246_p13, %p3245_p12 }
  0x1e   :  { %p3248_p1 = pnand %p3247_p0, %p3241_p11 }
  0x20   :  { %3251 = shalt.err (!%p3248_p1)
}
  0x21   :  { %42 = dma.hbm_to_vmem [thread:$0]  %s3863_s4, 2048, %s37_s12, [#allocation6], %s3257_s7, %s3257_s7, %s3258_s8  }
  0x22   :  { %3252 = dma.done.wait [#allocation4], 4096  }
  0x23   :  { %3253 = vsyncadd [#allocation4], 4294963200 }
  0x24   :  { %3254 = dma.done.wait [#allocation6], 2048  }
  0x25   :  { %3255 = vsyncadd [#allocation6], 4294965248  ;;  %v3260_v0 = vmov 0.0|0.0   ;;  %vm3261_vm0 = vmmov 0   ;;  %v3262_v1 = vmov 0.0   ;;  %v59_v2 = vld [vmem:[%s3860_s1] sm:$0xff] }
  0x26   :  { %2729 = vmatprep.subr.bf16.mxu1 %v3260_v0  ;;  %2090 = vmatprep.mubr.msk.f32.mxu1 %vm3261_vm0, %v3262_v1  ;;  %v60_v3 = vld [vmem:[%s3860_s1 + $0x8] sm:$0xff]  ;;  %v195_v4 = vld [vmem:[#allocation3] sm:$0xff]  ;;  %v61_v7 = vld [vmem:[%s3860_s1 + $0x10] sm:$0xff] }
  0x27   :  { %v2697_v5 = vpack.c.bf16 %v60_v3, %v59_v2  ;;  %v196_v6 = vld [vmem:[#allocation3 + $0x8] sm:$0xff]  ;;  %v62_v8 = vld [vmem:[%s3860_s1 + $0x18] sm:$0xff]  ;;  %v197_v11 = vld [vmem:[#allocation3 + $0x10] sm:$0xff] }
  0x28   :  { %v3337_v9 = vpack.c.bf16 %v196_v6, %v195_v4  ;;  %v2701_v10 = vpack.c.bf16 %v62_v8, %v61_v7  ;;  %v198_v12 = vld [vmem:[#allocation3 + $0x18] sm:$0xff]  ;;  %v63_v13 = vld [vmem:[%s3860_s1 + $0x20] sm:$0xff]  ;;  %v64_v14 = vld [vmem:[%s3860_s1 + $0x28] sm:$0xff] }
  0x29   :  { %2698 = vmatprep.subr.bf16.mxu0 %v2697_v5  ;;  %v3346_v15 = vpack.c.bf16 %v198_v12, %v197_v11  ;;  %v2705_v16 = vpack.c.bf16 %v64_v14, %v63_v13  ;;  %v199_v17 = vld [vmem:[#allocation3 + $0x20] sm:$0xff]  ;;  %v200_v18 = vld [vmem:[#allocation3 + $0x28] sm:$0xff]  ;;  %v65_v19 = vld [vmem:[%s3860_s1 + $0x30] sm:$0xff] }
  0x2a   :  { %2700 = vmatpush3.bf16.msra.mxu0 %v2697_v5  ;;  %2731 = vmatpush3.bf16.msra.mxu1 %v3337_v9  ;;  %v66_v20 = vld [vmem:[%s3860_s1 + $0x38] sm:$0xff]  ;;  %v3356_v21 = vpack.c.bf16 %v200_v18, %v199_v17  ;;  %v201_v23 = vld [vmem:[#allocation3 + $0x30] sm:$0xff]  ;;  %v67_v25 = vld [vmem:[%s3860_s1 + $0x40] sm:$0xff] }
  0x2b   :  { %2702 = vmatprep.subr.bf16.mxu0 %v2701_v10  ;;  %2732 = vmatprep.subr.bf16.mxu1 %v3260_v0  ;;  %v2709_v22 = vpack.c.bf16 %v66_v20, %v65_v19  ;;  %v202_v24 = vld [vmem:[#allocation3 + $0x38] sm:$0xff]  ;;  %v68_v26 = vld [vmem:[%s3860_s1 + $0x48] sm:$0xff]  ;;  %v51_v27 = vld [vmem:[%s3859_s0] sm:$0xff] }
  0x2c   :  { %2046 = vmatprep.mubr.f32.mxu0 %v51_v27  ;;  %v3369_v28 = vpack.c.bf16 %v202_v24, %v201_v23  ;;  %v2713_v29 = vpack.c.bf16 %v68_v26, %v67_v25  ;;  %v203_v30 = vld [vmem:[#allocation3 + $0x40] sm:$0xff]  ;;  %v204_v31 = vld [vmem:[#allocation3 + $0x48] sm:$0xff]  ;;  %v69_v32 = vld [vmem:[%s3860_s1 + $0x50] sm:$0xff] }
  0x2d   :  { %v70_v33 = vld [vmem:[%s3860_s1 + $0x58] sm:$0xff]  ;;  %v3379_v34 = vpack.c.bf16 %v204_v31, %v203_v30  ;;  %v205_v36 = vld [vmem:[#allocation3 + $0x50] sm:$0xff]  ;;  %v71_v38 = vld [vmem:[%s3860_s1 + $0x60] sm:$0xff] }
  0x2e   :  { %2704 = vmatpush3.bf16.msra.mxu0 %v2701_v10  ;;  %2734 = vmatpush3.bf16.msra.mxu1 %v3346_v15  ;;  %v2717_v35 = vpack.c.bf16 %v70_v33, %v69_v32  ;;  %v206_v37 = vld [vmem:[#allocation3 + $0x58] sm:$0xff]  ;;  %v72_v39 = vld [vmem:[%s3860_s1 + $0x68] sm:$0xff]  ;;  %v207_v42 = vld [vmem:[#allocation3 + $0x60] sm:$0xff] }
  0x2f   :  { %2706 = vmatprep.subr.bf16.mxu0 %v2705_v16  ;;  %2735 = vmatprep.subr.bf16.mxu1 %v3260_v0  ;;  %v3389_v40 = vpack.c.bf16 %v206_v37, %v205_v36  ;;  %v2721_v41 = vpack.c.bf16 %v72_v39, %v71_v38  ;;  %v208_v43 = vld [vmem:[#allocation3 + $0x68] sm:$0xff]  ;;  %v73_v44 = vld [vmem:[%s3860_s1 + $0x70] sm:$0xff]  ;;  %v74_v45 = vld [vmem:[%s3860_s1 + $0x78] sm:$0xff] }
  0x30   :  { %v3399_v46 = vpack.c.bf16 %v208_v43, %v207_v42  ;;  %v2725_v47 = vpack.c.bf16 %v74_v45, %v73_v44  ;;  %v209_v48 = vld [vmem:[#allocation3 + $0x70] sm:$0xff]  ;;  %v210_v49 = vld [vmem:[#allocation3 + $0x78] sm:$0xff]  ;;  %v52_v51 = vld [vmem:[%s3859_s0 + $0x8] sm:$0xff] }
  0x31   :  { %v3403_v50 = vpack.c.bf16 %v210_v49, %v209_v48  ;;  %v53_v52 = vld [vmem:[%s3859_s0 + $0x10] sm:$0xff]  ;;  %v54_v53 = vld [vmem:[%s3859_s0 + $0x18] sm:$0xff]  ;;  %v55_v54 = vld [vmem:[%s3859_s0 + $0x20] sm:$0xff] }
  0x32   :  { %2708 = vmatpush3.bf16.msra.mxu0 %v2705_v16  ;;  %2737 = vmatpush3.bf16.msra.mxu1 %v3356_v21  ;;  %v56_v55 = vld [vmem:[%s3859_s0 + $0x28] sm:$0xff]  ;;  %v57_v56 = vld [vmem:[%s3859_s0 + $0x30] sm:$0xff]  ;;  %v58_v57 = vld [vmem:[%s3859_s0 + $0x38] sm:$0xff] }
  0x33   :  { %2710 = vmatprep.subr.bf16.mxu0 %v2709_v22  ;;  %2738 = vmatprep.subr.bf16.mxu1 %v3260_v0  ;;  %v3470_v58 = vld [vmem:[%s3862_s3] ss:$0 sm:$0xff]  ;;  %v1660_v37 = vld [vmem:[%s3860_s1 + $0x90] sm:$0xff]  ;;  %v1661_v38 = vld [vmem:[%s3860_s1 + $0x98] sm:$0xff] }
  0x34   :  { %v2925_v39 = vpack.c.bf16 %v1661_v38, %v1660_v37  ;;  %v1663_v42 = vld [vmem:[%s3860_s1 + $0xa8] sm:$0xff]  ;;  %v1664_v44 = vld [vmem:[%s3860_s1 + $0xb0] sm:$0xff]  ;;  %v1665_v45 = vld [vmem:[%s3860_s1 + $0xb8] sm:$0xff] }
  0x35   :  { %v1667_v48 = vld [vmem:[%s3860_s1 + $0xc8] sm:$0xff] }
  0x36   :  { %2712 = vmatpush3.bf16.msra.mxu0 %v2709_v22  ;;  %2740 = vmatpush3.bf16.msra.mxu1 %v3369_v28 }
  0x37   :  { %2714 = vmatprep.subr.bf16.mxu0 %v2713_v29  ;;  %2741 = vmatprep.subr.bf16.mxu1 %v3260_v0 }
  0x3a   :  { %2716 = vmatpush3.bf16.msra.mxu0 %v2713_v29  ;;  %2743 = vmatpush3.bf16.msra.mxu1 %v3379_v34 }
  0x3b   :  { %2718 = vmatprep.subr.bf16.mxu0 %v2717_v35  ;;  %2744 = vmatprep.subr.bf16.mxu1 %v3260_v0 }
  0x3e   :  { %2720 = vmatpush3.bf16.msra.mxu0 %v2717_v35  ;;  %2746 = vmatpush3.bf16.msra.mxu1 %v3389_v40 }
  0x3f   :  { %2722 = vmatprep.subr.bf16.mxu0 %v2721_v41  ;;  %2747 = vmatprep.subr.bf16.mxu1 %v3260_v0 }
  0x42   :  { %2724 = vmatpush3.bf16.msra.mxu0 %v2721_v41  ;;  %2749 = vmatpush3.bf16.msra.mxu1 %v3399_v46  ;;  %v1662_v41 = vld [vmem:[%s3860_s1 + $0xa0] sm:$0xff] }
  0x43   :  { %2726 = vmatprep.subr.bf16.mxu0 %v2725_v47  ;;  %2750 = vmatprep.subr.bf16.mxu1 %v3260_v0  ;;  %v2929_v43 = vpack.c.bf16 %v1663_v42, %v1662_v41 }
  0x46   :  { %2728 = vmatpush3.bf16.msra.mxu0 %v2725_v47  ;;  %2752 = vmatpush3.bf16.msra.mxu1 %v3403_v50  ;;  %v1666_v47 = vld [vmem:[%s3860_s1 + $0xc0] sm:$0xff] }
  0x47   :  { %2753 = vmatprep.subr.bf16.mxu0 %v3260_v0  ;;  %2777 = vmatprep.subr.bf16.mxu1 %v3260_v0  ;;  %v2937_v49 = vpack.c.bf16 %v1667_v48, %v1666_v47 }
  0x49   :  { %2047 = vmatmul.mubr.f32.vlgmr.msra.gmra.mrb[0].mxu0 %v52_v51  ;;  %2091 = vmatmul.mubr.f32.vlgmr.msra.gmra.mrb[0].mxu1 %v3262_v1  ;;  %v1669_v51 = vld [vmem:[%s3860_s1 + $0xd8] sm:$0xff] }
  0x4a   :  { %2755 = vmatpush3.bf16.msra.mxu0 %v3337_v9  ;;  %2779 = vmatpush3.bf16.msra.mxu1 %v3337_v9 }
  0x4b   :  { %2756 = vmatprep.subr.bf16.mxu0 %v3260_v0  ;;  %2780 = vmatprep.subr.bf16.mxu1 %v3260_v0 }
  0x4c   :  { %2160 = vmatprep.mubr.msk.f32.mxu1 %vm3261_vm0, %v3262_v1  ;;  %2049 = vmatprep.mubr.f32.mxu0 %v53_v52 }
  0x4d   :  { %2050 = vmatmul.mubr.f32.gmra.mrb[2].mxu0 %v54_v53  ;;  %v1670_v53 = vld [vmem:[%s3860_s1 + $0xe0] sm:$0xff] }
  0x4e   :  { %2758 = vmatpush3.bf16.msra.mxu0 %v3346_v15  ;;  %2782 = vmatpush3.bf16.msra.mxu1 %v3346_v15 }
  0x4f   :  { %2759 = vmatprep.subr.bf16.mxu0 %v3260_v0  ;;  %2783 = vmatprep.subr.bf16.mxu1 %v3260_v0 }
  0x50   :  { %2052 = vmatprep.mubr.f32.mxu0 %v55_v54  ;;  %v1671_v54 = vld [vmem:[%s3860_s1 + $0xe8] sm:$0xff] }
  0x51   :  { %2053 = vmatmul.mubr.f32.gmra.mrb[4].mxu0 %v56_v55  ;;  %v2945_v55 = vpack.c.bf16 %v1671_v54, %v1670_v53 }
  0x52   :  { %2761 = vmatpush3.bf16.msra.mxu0 %v3356_v21  ;;  %2785 = vmatpush3.bf16.msra.mxu1 %v3356_v21 }
  0x53   :  { %2762 = vmatprep.subr.bf16.mxu0 %v3260_v0  ;;  %2786 = vmatprep.subr.bf16.mxu1 %v3260_v0 }
  0x54   :  { %2055 = vmatprep.mubr.f32.mxu0 %v57_v56  ;;  %v1672_v56 = vld [vmem:[%s3860_s1 + $0xf0] sm:$0xff] }
  0x55   :  { %2056 = vmatmul.mubr.f32.gmra.mrb[6].mxu0 %v58_v57  ;;  %v1673_v57 = vld [vmem:[%s3860_s1 + $0xf8] sm:$0xff] }
  0x56   :  { %2764 = vmatpush3.bf16.msra.mxu0 %v3369_v28  ;;  %2788 = vmatpush3.bf16.msra.mxu1 %v3369_v28 }
  0x57   :  { %2765 = vmatprep.subr.bf16.mxu0 %v3260_v0  ;;  %2789 = vmatprep.subr.bf16.mxu1 %v3260_v0 }
  0x58   :  { %2125 = vmatprep.mubr.msk.f32.mxu0 %vm3261_vm0, %v3262_v1 }
  0x5a   :  { %2767 = vmatpush3.bf16.msra.mxu0 %v3379_v34  ;;  %2791 = vmatpush3.bf16.msra.mxu1 %v3379_v34 }
  0x5b   :  { %2768 = vmatprep.subr.bf16.mxu0 %v3260_v0  ;;  %2792 = vmatprep.subr.bf16.mxu1 %v3260_v0 }
  0x5e   :  { %2770 = vmatpush3.bf16.msra.mxu0 %v3389_v40  ;;  %2794 = vmatpush3.bf16.msra.mxu1 %v3389_v40 }
  0x5f   :  { %2771 = vmatprep.subr.bf16.mxu0 %v3260_v0  ;;  %2795 = vmatprep.subr.bf16.mxu1 %v3260_v0 }
  0x62   :  { %2773 = vmatpush3.bf16.msra.mxu0 %v3399_v46  ;;  %2797 = vmatpush3.bf16.msra.mxu1 %v3399_v46 }
  0x63   :  { %2774 = vmatprep.subr.bf16.mxu0 %v3260_v0  ;;  %2798 = vmatprep.subr.bf16.mxu1 %v3260_v0 }
  0x66   :  { %2776 = vmatpush3.bf16.msra.mxu0 %v3403_v50  ;;  %2800 = vmatpush3.bf16.msra.mxu1 %v3403_v50 }
  0x67   :  { %2801 = vmatprep.subr.bf16.mxu0 %v3260_v0  ;;  %2825 = vmatprep.subr.bf16.mxu1 %v3260_v0 }
 0x11c   :  { %v2048_v59 = vpop.f32.mrb[0].mxu0  ;;  %v278_v60 = vpop.f32.mrb[0].mxu1 }
 0x11d   :  { %v148_v61 = vpop.f32.mrb[1].mxu0  ;;  %v2092_v62 = vpop.f32.mrb[1].mxu1  ;;  %v154_v11 = vadd.f32 %v2048_v59, %v3470_v58  ;;  %v2949_v59 = vpack.c.bf16 %v1673_v57, %v1672_v56 }
 0x11e   :  { %v149_v63 = vadd.f32 %v3470_v58, %v148_v61  ;;  %v958_v61 = vld [vmem:[#allocation3 + $0x88] sm:$0xff] }
 0x120   :  { %v282_v2 = vadd.f32 %v278_v60, %v149_v63  ;;  %v2051_v4 = vpop.f32.mrb[2].mxu0  ;;  %v957_v60 = vld [vmem:[#allocation3 + $0x80] sm:$0xff]  ;;  %v959_v63 = vld [vmem:[#allocation3 + $0x90] sm:$0xff] }
 0x121   :  { %v158_v5 = vpop.f32.mrb[3].mxu0  ;;  %v164_v23 = vadd.f32 %v2051_v4, %v3470_v58  ;;  %v3646_v62 = vpack.c.bf16 %v958_v61, %v957_v60  ;;  %v961_v4 = vld [vmem:[#allocation3 + $0xa0] sm:$0xff] }
 0x122   :  { %3176 = vtanh.f32 %v282_v2  ;;  %v159_v17 = vadd.f32 %v3470_v58, %v158_v5  ;;  %v960_v2 = vld [vmem:[#allocation3 + $0x98] sm:$0xff]  ;;  %v962_v5 = vld [vmem:[#allocation3 + $0xa8] sm:$0xff] }
 0x124   :  { %v3494_v6 = vpop.f32.mrb[4].mxu0 }
 0x125   :  { %v3496_v7 = vpop.f32.mrb[5].mxu0 }
 0x126   :  { %v169_v29 = vadd.f32 %v3470_v58, %v3496_v7  ;;  %v963_v7 = vld [vmem:[#allocation3 + $0xb0] sm:$0xff] }
 0x128   :  { %v3498_v8 = vpop.f32.mrb[6].mxu0 }
 0x129   :  { %v3500_v10 = vpop.f32.mrb[7].mxu0 }
 0x12c   :  { %v3473_v3 = vpop.eup %3176 }
 0x12d   :  { %2126 = vmatmul.mubr.f32.vlgmr.msra.gmra.mrb[8].mxu0 %v3473_v3 }
 0x12e   :  { %2803 = vmatpush3.bf16.msra.mxu0 %v3337_v9  ;;  %2195 = vmatprep.mubr.msk.f32.mxu0 %vm3261_vm0, %v3262_v1 }
 0x12f   :  { %2804 = vmatprep.subr.bf16.mxu0 %v3260_v0 }
 0x132   :  { %2806 = vmatpush3.bf16.msra.mxu0 %v3346_v15 }
 0x133   :  { %2807 = vmatprep.subr.bf16.mxu0 %v3260_v0 }
 0x136   :  { %2809 = vmatpush3.bf16.msra.mxu0 %v3356_v21 }
 0x137   :  { %2810 = vmatprep.subr.bf16.mxu0 %v3260_v0 }
 0x13a   :  { %2812 = vmatpush3.bf16.msra.mxu0 %v3369_v28 }
 0x13b   :  { %2813 = vmatprep.subr.bf16.mxu0 %v3260_v0 }
 0x13e   :  { %2815 = vmatpush3.bf16.msra.mxu0 %v3379_v34 }
 0x13f   :  { %2816 = vmatprep.subr.bf16.mxu0 %v3260_v0 }
 0x142   :  { %2818 = vmatpush3.bf16.msra.mxu0 %v3389_v40 }
 0x143   :  { %2819 = vmatprep.subr.bf16.mxu0 %v3260_v0 }
 0x146   :  { %2821 = vmatpush3.bf16.msra.mxu0 %v3399_v46 }
 0x147   :  { %2822 = vmatprep.subr.bf16.mxu0 %v3260_v0 }
 0x14a   :  { %2824 = vmatpush3.bf16.msra.mxu0 %v3403_v50 }
 0x14b   :  { %2849 = vmatprep.subr.bf16.mxu0 %v3260_v0 }
 0x200   :  { %v353_v12 = vpop.f32.mrb[8].mxu0 }
 0x201   :  { %v357_v13 = vadd.f32 %v353_v12, %v154_v11  ;;  %v2127_v14 = vpop.f32.mrb[9].mxu0  ;;  %v964_v11 = vld [vmem:[#allocation3 + $0xb8] sm:$0xff] }
 0x202   :  { %v3658_v12 = vpack.c.bf16 %v964_v11, %v963_v7  ;;  %v966_v14 = vld [vmem:[#allocation3 + $0xc8] sm:$0xff] }
 0x203   :  { %3178 = vtanh.f32 %v357_v13  ;;  %v965_v13 = vld [vmem:[#allocation3 + $0xc0] sm:$0xff] }
 0x20d   :  { %v3503_v16 = vpop.eup %3178 }
 0x20e   :  { %2161 = vmatmul.mubr.f32.vlgmr.msra.gmra.mrb[2].mxu1 %v3503_v16 }
 0x20f   :  { %2827 = vmatpush3.bf16.msra.mxu1 %v3337_v9  ;;  %2230 = vmatprep.mubr.msk.f32.mxu1 %vm3261_vm0, %v3262_v1 }
 0x210   :  { %2828 = vmatprep.subr.bf16.mxu1 %v3260_v0 }
 0x213   :  { %2830 = vmatpush3.bf16.msra.mxu1 %v3346_v15 }
 0x214   :  { %2831 = vmatprep.subr.bf16.mxu1 %v3260_v0 }
 0x217   :  { %2833 = vmatpush3.bf16.msra.mxu1 %v3356_v21 }
 0x218   :  { %2834 = vmatprep.subr.bf16.mxu1 %v3260_v0 }
 0x21b   :  { %2836 = vmatpush3.bf16.msra.mxu1 %v3369_v28 }
 0x21c   :  { %2837 = vmatprep.subr.bf16.mxu1 %v3260_v0 }
 0x21f   :  { %2839 = vmatpush3.bf16.msra.mxu1 %v3379_v34 }
 0x220   :  { %2840 = vmatprep.subr.bf16.mxu1 %v3260_v0 }
 0x223   :  { %2842 = vmatpush3.bf16.msra.mxu1 %v3389_v40 }
 0x224   :  { %2843 = vmatprep.subr.bf16.mxu1 %v3260_v0 }
 0x227   :  { %2845 = vmatpush3.bf16.msra.mxu1 %v3399_v46 }
 0x228   :  { %2846 = vmatprep.subr.bf16.mxu1 %v3260_v0 }
 0x22b   :  { %2848 = vmatpush3.bf16.msra.mxu1 %v3403_v50 }
 0x22c   :  { %2873 = vmatprep.subr.bf16.mxu1 %v3260_v0 }
 0x2e1   :  { %v428_v18 = vpop.f32.mrb[2].mxu1 }
 0x2e2   :  { %v432_v19 = vadd.f32 %v428_v18, %v159_v17  ;;  %v2162_v20 = vpop.f32.mrb[3].mxu1  ;;  %v967_v17 = vld [vmem:[#allocation3 + $0xd0] sm:$0xff]  ;;  %v968_v18 = vld [vmem:[#allocation3 + $0xd8] sm:$0xff] }
 0x2e3   :  { %v969_v20 = vld [vmem:[#allocation3 + $0xe0] sm:$0xff] }
 0x2e4   :  { %3180 = vtanh.f32 %v432_v19  ;;  %v3666_v19 = vpack.c.bf16 %v968_v18, %v967_v17  ;;  %v1560_v17 = vld [vmem:[#allocation5 + $0x18] sm:$0xff] }
 0x2ee   :  { %v3525_v22 = vpop.eup %3180 }
 0x2ef   :  { %2196 = vmatmul.mubr.f32.vlgmr.msra.gmra.mrb[10].mxu0 %v3525_v22 }
 0x2f0   :  { %2851 = vmatpush3.bf16.msra.mxu0 %v3337_v9  ;;  %2265 = vmatprep.mubr.msk.f32.mxu0 %vm3261_vm0, %v3262_v1 }
 0x2f1   :  { %2852 = vmatprep.subr.bf16.mxu0 %v3260_v0 }
 0x2f4   :  { %2854 = vmatpush3.bf16.msra.mxu0 %v3346_v15 }
 0x2f5   :  { %2855 = vmatprep.subr.bf16.mxu0 %v3260_v0 }
 0x2f8   :  { %2857 = vmatpush3.bf16.msra.mxu0 %v3356_v21 }
 0x2f9   :  { %2858 = vmatprep.subr.bf16.mxu0 %v3260_v0 }
 0x2fc   :  { %2860 = vmatpush3.bf16.msra.mxu0 %v3369_v28 }
 0x2fd   :  { %2861 = vmatprep.subr.bf16.mxu0 %v3260_v0 }
 0x300   :  { %2863 = vmatpush3.bf16.msra.mxu0 %v3379_v34 }
 0x301   :  { %2864 = vmatprep.subr.bf16.mxu0 %v3260_v0 }
 0x304   :  { %2866 = vmatpush3.bf16.msra.mxu0 %v3389_v40 }
 0x305   :  { %2867 = vmatprep.subr.bf16.mxu0 %v3260_v0 }
 0x308   :  { %2869 = vmatpush3.bf16.msra.mxu0 %v3399_v46 }
 0x309   :  { %2870 = vmatprep.subr.bf16.mxu0 %v3260_v0 }
 0x30c   :  { %2872 = vmatpush3.bf16.msra.mxu0 %v3403_v50 }
 0x30d   :  { %2897 = vmatprep.subr.bf16.mxu0 %v3260_v0 }
 0x3c2   :  { %v503_v24 = vpop.f32.mrb[10].mxu0 }
 0x3c3   :  { %v507_v25 = vadd.f32 %v503_v24, %v164_v23  ;;  %v2197_v26 = vpop.f32.mrb[11].mxu0  ;;  %v971_v24 = vld [vmem:[#allocation3 + $0xf0] sm:$0xff] }
 0x3c5   :  { %3182 = vtanh.f32 %v507_v25  ;;  %v972_v25 = vld [vmem:[#allocation3 + $0xf8] sm:$0xff] }
 0x3c6   :  { %v3674_v26 = vpack.c.bf16 %v972_v25, %v971_v24  ;;  %v1564_v24 = vld [vmem:[#allocation5 + $0x38] sm:$0xff] }
 0x3cf   :  { %v3547_v27 = vpop.eup %3182 }
 0x3d0   :  { %2231 = vmatmul.mubr.f32.vlgmr.msra.gmra.mrb[4].mxu1 %v3547_v27 }
 0x3d1   :  { %2875 = vmatpush3.bf16.msra.mxu1 %v3337_v9  ;;  %2300 = vmatprep.mubr.msk.f32.mxu1 %vm3261_vm0, %v3262_v1 }
 0x3d2   :  { %2876 = vmatprep.subr.bf16.mxu1 %v3260_v0 }
 0x3d5   :  { %2878 = vmatpush3.bf16.msra.mxu1 %v3346_v15 }
 0x3d6   :  { %2879 = vmatprep.subr.bf16.mxu1 %v3260_v0 }
 0x3d9   :  { %2881 = vmatpush3.bf16.msra.mxu1 %v3356_v21 }
 0x3da   :  { %2882 = vmatprep.subr.bf16.mxu1 %v3260_v0 }
 0x3dd   :  { %2884 = vmatpush3.bf16.msra.mxu1 %v3369_v28 }
 0x3de   :  { %2885 = vmatprep.subr.bf16.mxu1 %v3260_v0 }
 0x3e1   :  { %2887 = vmatpush3.bf16.msra.mxu1 %v3379_v34 }
 0x3e2   :  { %2888 = vmatprep.subr.bf16.mxu1 %v3260_v0 }
 0x3e5   :  { %2890 = vmatpush3.bf16.msra.mxu1 %v3389_v40 }
 0x3e6   :  { %2891 = vmatprep.subr.bf16.mxu1 %v3260_v0 }
 0x3e9   :  { %2893 = vmatpush3.bf16.msra.mxu1 %v3399_v46 }
 0x3ea   :  { %2894 = vmatprep.subr.bf16.mxu1 %v3260_v0 }
 0x3ed   :  { %2896 = vmatpush3.bf16.msra.mxu1 %v3403_v50 }
 0x4a3   :  { %v578_v30 = vpop.f32.mrb[4].mxu1 }
 0x4a4   :  { %v582_v31 = vadd.f32 %v578_v30, %v169_v29  ;;  %v2232_v32 = vpop.f32.mrb[5].mxu1 }
 0x4a6   :  { %3184 = vtanh.f32 %v582_v31 }
 0x4b0   :  { %v3569_v33 = vpop.eup %3184 }
 0x4b1   :  { %2266 = vmatmul.mubr.f32.vlgmr.msra.gmra.mrb[12].mxu0 %v3569_v33 }
 0x4b2   :  { %2899 = vmatpush3.bf16.msra.mxu0 %v3337_v9  ;;  %2335 = vmatprep.mubr.msk.f32.mxu0 %vm3261_vm0, %v3262_v1  ;;  %v1658_v9 = vld [vmem:[%s3860_s1 + $0x80] sm:$0xff] }
 0x4b3   :  { %2900 = vmatprep.subr.bf16.mxu0 %v3260_v0 }
 0x4b6   :  { %2902 = vmatpush3.bf16.msra.mxu0 %v3346_v15  ;;  %v1659_v15 = vld [vmem:[%s3860_s1 + $0x88] sm:$0xff] }
 0x4b7   :  { %2903 = vmatprep.subr.bf16.mxu0 %v3260_v0 }
 0x4ba   :  { %2905 = vmatpush3.bf16.msra.mxu0 %v3356_v21  ;;  %v2921_v21 = vpack.c.bf16 %v1659_v15, %v1658_v9 }
 0x4bb   :  { %2906 = vmatprep.subr.bf16.mxu0 %v3260_v0 }
 0x4bc   :  { %2922 = vmatprep.subr.bf16.mxu1 %v2921_v21 }
 0x4be   :  { %2908 = vmatpush3.bf16.msra.mxu0 %v3369_v28  ;;  %v174_v28 = vadd.f32 %v3494_v6, %v3470_v58  ;;  %v3654_v6 = vpack.c.bf16 %v962_v5, %v961_v4 }
 0x4bf   :  { %2909 = vmatprep.subr.bf16.mxu0 %v3260_v0 }
 0x4c2   :  { %2911 = vmatpush3.bf16.msra.mxu0 %v3379_v34 }
 0x4c3   :  { %2912 = vmatprep.subr.bf16.mxu0 %v3260_v0 }
 0x4c6   :  { %2914 = vmatpush3.bf16.msra.mxu0 %v3389_v40 }
 0x4c7   :  { %2915 = vmatprep.subr.bf16.mxu0 %v3260_v0 }
 0x4ca   :  { %2917 = vmatpush3.bf16.msra.mxu0 %v3399_v46  ;;  %v2933_v46 = vpack.c.bf16 %v1665_v45, %v1664_v44 }
 0x4cb   :  { %2918 = vmatprep.subr.bf16.mxu0 %v3260_v0 }
 0x4ce   :  { %2920 = vmatpush3.bf16.msra.mxu0 %v3403_v50  ;;  %v1668_v50 = vld [vmem:[%s3860_s1 + $0xd0] sm:$0xff] }
 0x4cf   :  { %2953 = vmatprep.subr.bf16.mxu0 %v3260_v0  ;;  %v2941_v52 = vpack.c.bf16 %v1669_v51, %v1668_v50 }
 0x584   :  { %v653_v34 = vpop.f32.mrb[12].mxu0 }
 0x585   :  { %v657_v35 = vadd.f32 %v653_v34, %v174_v28  ;;  %v2267_v36 = vpop.f32.mrb[13].mxu0  ;;  %v184_v34 = vadd.f32 %v3498_v8, %v3470_v58 }
 0x587   :  { %3186 = vtanh.f32 %v657_v35 }
 0x591   :  { %v3187_v40 = vpop.eup %3186 }
 0x592   :  { %2301 = vmatmul.mubr.f32.vlgmr.msra.gmra.mrb[6].mxu1 %v3187_v40 }
 0x593   :  { %2924 = vmatpush3.bf16.msra.mxu1 %v2921_v21  ;;  %2370 = vmatprep.mubr.f32.mxu1 %v3473_v3  ;;  %v3650_v3 = vpack.c.bf16 %v960_v2, %v959_v63 }
 0x594   :  { %2926 = vmatprep.subr.bf16.mxu1 %v2925_v39 }
 0x597   :  { %2928 = vmatpush3.bf16.msra.mxu1 %v2925_v39  ;;  %v3734_v39 = vld [vmem:[%s3862_s3 + $0x1] ss:$0 sm:$0xff] }
 0x598   :  { %2930 = vmatprep.subr.bf16.mxu1 %v2929_v43 }
 0x59b   :  { %2932 = vmatpush3.bf16.msra.mxu1 %v2929_v43 }
 0x59c   :  { %2934 = vmatprep.subr.bf16.mxu1 %v2933_v46 }
 0x59f   :  { %2936 = vmatpush3.bf16.msra.mxu1 %v2933_v46 }
 0x5a0   :  { %2938 = vmatprep.subr.bf16.mxu1 %v2937_v49 }
 0x5a3   :  { %2940 = vmatpush3.bf16.msra.mxu1 %v2937_v49 }
 0x5a4   :  { %2942 = vmatprep.subr.bf16.mxu1 %v2941_v52 }
 0x5a7   :  { %2944 = vmatpush3.bf16.msra.mxu1 %v2941_v52 }
 0x5a8   :  { %2946 = vmatprep.subr.bf16.mxu1 %v2945_v55 }
 0x5ab   :  { %2948 = vmatpush3.bf16.msra.mxu1 %v2945_v55 }
 0x5ac   :  { %2950 = vmatprep.subr.bf16.mxu1 %v2949_v59 }
 0x5af   :  { %2952 = vmatpush3.bf16.msra.mxu1 %v2949_v59 }
 0x5b0   :  { %2977 = vmatprep.subr.bf16.mxu1 %v3260_v0 }
 0x5b2   :  { %2371 = vmatmul.mubr.f32.vlgmr.msra.gmra.mrb[8].mxu1 %v3503_v16  ;;  %v3662_v16 = vpack.c.bf16 %v966_v14, %v965_v13  ;;  %v1558_v13 = vld [vmem:[#allocation5 + $0x8] sm:$0xff]  ;;  %v1559_v14 = vld [vmem:[#allocation5 + $0x10] sm:$0xff] }
 0x5b3   :  { %2373 = vmatprep.mubr.f32.mxu1 %v3525_v22  ;;  %2979 = vmatpush3.bf16.msra.mxu1 %v3646_v62  ;;  %v970_v22 = vld [vmem:[#allocation3 + $0xe8] sm:$0xff]  ;;  %v3149_v18 = vpack.c.bf16 %v1560_v17, %v1559_v14 }
 0x5b4   :  { %2980 = vmatprep.subr.bf16.mxu1 %v3260_v0  ;;  %v3670_v23 = vpack.c.bf16 %v970_v22, %v969_v20  ;;  %v1562_v20 = vld [vmem:[#allocation5 + $0x28] sm:$0xff] }
 0x5b6   :  { %2374 = vmatmul.mubr.f32.gmra.mrb[10].mxu1 %v3547_v27  ;;  %v179_v27 = vadd.f32 %v3470_v58, %v3500_v10 }
 0x5b7   :  { %2376 = vmatprep.mubr.f32.mxu1 %v3569_v33  ;;  %2982 = vmatpush3.bf16.msra.mxu1 %v3650_v3 }
 0x5b8   :  { %2983 = vmatprep.subr.bf16.mxu1 %v3260_v0 }
 0x5ba   :  { %2377 = vmatmul.mubr.f32.gmra.mrb[12].mxu1 %v3187_v40 }
 0x5bb   :  { %2985 = vmatpush3.bf16.msra.mxu1 %v3654_v6 }
 0x5bc   :  { %2986 = vmatprep.subr.bf16.mxu1 %v3260_v0 }
 0x5bf   :  { %2988 = vmatpush3.bf16.msra.mxu1 %v3658_v12 }
 0x5c0   :  { %2989 = vmatprep.subr.bf16.mxu1 %v3260_v0 }
 0x5c3   :  { %2991 = vmatpush3.bf16.msra.mxu1 %v3662_v16 }
 0x5c4   :  { %2992 = vmatprep.subr.bf16.mxu1 %v3260_v0 }
 0x5c7   :  { %2994 = vmatpush3.bf16.msra.mxu1 %v3666_v19 }
 0x5c8   :  { %2995 = vmatprep.subr.bf16.mxu1 %v3260_v0 }
 0x5cb   :  { %2997 = vmatpush3.bf16.msra.mxu1 %v3670_v23 }
 0x5cc   :  { %2998 = vmatprep.subr.bf16.mxu1 %v3260_v0 }
 0x5cf   :  { %3000 = vmatpush3.bf16.msra.mxu1 %v3674_v26 }
 0x5d0   :  { %3025 = vmatprep.subr.bf16.mxu1 %v3260_v0 }
 0x665   :  { %v728_v29 = vpop.f32.mrb[6].mxu1 }
 0x666   :  { %v732_v30 = vadd.f32 %v728_v29, %v179_v27  ;;  %v2302_v31 = vpop.f32.mrb[7].mxu1 }
 0x668   :  { %3188 = vtanh.f32 %v732_v30 }
 0x672   :  { %v3189_v32 = vpop.eup %3188 }
 0x673   :  { %2336 = vmatmul.mubr.f32.vlgmr.msra.gmra.mrb[14].mxu0 %v3189_v32  ;;  %2379 = vmatprep.mubr.f32.mxu1 %v3189_v32 }
 0x674   :  { %2955 = vmatpush3.bf16.msra.mxu0 %v3646_v62  ;;  %2414 = vmatprep.mubr.msk.f32.mxu0 %vm3261_vm0, %v3262_v1 }
 0x675   :  { %2956 = vmatprep.subr.bf16.mxu0 %v3260_v0 }
 0x678   :  { %2958 = vmatpush3.bf16.msra.mxu0 %v3650_v3 }
 0x679   :  { %2959 = vmatprep.subr.bf16.mxu0 %v3260_v0 }
 0x67c   :  { %2961 = vmatpush3.bf16.msra.mxu0 %v3654_v6 }
 0x67d   :  { %2962 = vmatprep.subr.bf16.mxu0 %v3260_v0 }
 0x680   :  { %2964 = vmatpush3.bf16.msra.mxu0 %v3658_v12 }
 0x681   :  { %2965 = vmatprep.subr.bf16.mxu0 %v3260_v0 }
 0x684   :  { %2967 = vmatpush3.bf16.msra.mxu0 %v3662_v16 }
 0x685   :  { %v3691_v10 = vpop.f32.mrb[8].mxu1  ;;  %2968 = vmatprep.subr.bf16.mxu0 %v3260_v0 }
 0x686   :  { %v909_v33 = vpop.f32.mrb[9].mxu1  ;;  %v915_v45 = vadd.f32 %v3691_v10, %v3734_v39 }
 0x687   :  { %v910_v40 = vadd.f32 %v3734_v39, %v909_v33  ;;  %v1567_v33 = vld [vmem:[#allocation5 + $0x50] sm:$0xff] }
 0x688   :  { %2970 = vmatpush3.bf16.msra.mxu0 %v3666_v19 }
 0x689   :  { %v3695_v9 = vpop.f32.mrb[10].mxu1  ;;  %2971 = vmatprep.subr.bf16.mxu0 %v3260_v0 }
 0x68a   :  { %v3698_v15 = vpop.f32.mrb[11].mxu1  ;;  %v925_v55 = vadd.f32 %v3695_v9, %v3734_v39  ;;  %v1568_v9 = vld [vmem:[#allocation5 + $0x58] sm:$0xff] }
 0x68b   :  { %v920_v50 = vadd.f32 %v3734_v39, %v3698_v15  ;;  %v3161_v15 = vpack.c.bf16 %v1568_v9, %v1567_v33 }
 0x68c   :  { %2973 = vmatpush3.bf16.msra.mxu0 %v3670_v23 }
 0x68d   :  { %v3701_v21 = vpop.f32.mrb[12].mxu1  ;;  %2974 = vmatprep.subr.bf16.mxu0 %v3260_v0 }
 0x68e   :  { %v3704_v28 = vpop.f32.mrb[13].mxu1 }
 0x68f   :  { %v930_v61 = vadd.f32 %v3734_v39, %v3704_v28  ;;  %v1570_v28 = vld [vmem:[#allocation5 + $0x68] sm:$0xff] }
 0x690   :  { %2976 = vmatpush3.bf16.msra.mxu0 %v3674_v26 }
 0x691   :  { %3001 = vmatprep.subr.bf16.mxu0 %v3260_v0 }
 0x693   :  { %2415 = vmatmul.mubr.f32.vlgmr.msra.gmra.mrb[16].mxu0 %v3262_v1 }
 0x694   :  { %3003 = vmatpush3.bf16.msra.mxu0 %v3646_v62  ;;  %2484 = vmatprep.mubr.msk.f32.mxu0 %vm3261_vm0, %v3262_v1 }
 0x695   :  { %3004 = vmatprep.subr.bf16.mxu0 %v3260_v0 }
 0x698   :  { %3006 = vmatpush3.bf16.msra.mxu0 %v3650_v3 }
 0x699   :  { %3007 = vmatprep.subr.bf16.mxu0 %v3260_v0 }
 0x69c   :  { %3009 = vmatpush3.bf16.msra.mxu0 %v3654_v6 }
 0x69d   :  { %3010 = vmatprep.subr.bf16.mxu0 %v3260_v0 }
 0x6a0   :  { %3012 = vmatpush3.bf16.msra.mxu0 %v3658_v12 }
 0x6a1   :  { %3013 = vmatprep.subr.bf16.mxu0 %v3260_v0 }
 0x6a4   :  { %3015 = vmatpush3.bf16.msra.mxu0 %v3662_v16 }
 0x6a5   :  { %3016 = vmatprep.subr.bf16.mxu0 %v3260_v0 }
 0x6a8   :  { %3018 = vmatpush3.bf16.msra.mxu0 %v3666_v19 }
 0x6a9   :  { %3019 = vmatprep.subr.bf16.mxu0 %v3260_v0 }
 0x6ac   :  { %3021 = vmatpush3.bf16.msra.mxu0 %v3670_v23 }
 0x6ad   :  { %3022 = vmatprep.subr.bf16.mxu0 %v3260_v0 }
 0x6b0   :  { %3024 = vmatpush3.bf16.msra.mxu0 %v3674_v26 }
 0x6b1   :  { %3049 = vmatprep.subr.bf16.mxu0 %v3260_v0 }
 0x746   :  { %v803_v35 = vpop.f32.mrb[14].mxu0 }
 0x747   :  { %v807_v36 = vadd.f32 %v803_v35, %v184_v34  ;;  %v2337_v37 = vpop.f32.mrb[15].mxu0  ;;  %v1571_v35 = vld [vmem:[#allocation5 + $0x70] sm:$0xff] }
 0x749   :  { %3190 = vtanh.f32 %v807_v36  ;;  %v1572_v36 = vld [vmem:[#allocation5 + $0x78] sm:$0xff] }
 0x74a   :  { %v3167_v37 = vpack.c.bf16 %v1572_v36, %v1571_v35 }
 0x753   :  { %v3191_v38 = vpop.eup %3190 }
 0x754   :  { %2380 = vmatmul.mubr.f32.gmra.mrb[14].mxu1 %v3191_v38 }
 0x755   :  { %2449 = vmatprep.mubr.msk.f32.mxu1 %vm3261_vm0, %v3262_v1 }
 0x766   :  { %v1040_v41 = vpop.f32.mrb[16].mxu0 }
 0x767   :  { %v1044_v42 = vadd.f32 %v1040_v41, %v910_v40  ;;  %v2416_v43 = vpop.f32.mrb[17].mxu0 }
 0x769   :  { %3192 = vtanh.f32 %v1044_v42 }
 0x773   :  { %v3193_v58 = vpop.eup %3192 }
 0x774   :  { %2450 = vmatmul.mubr.f32.vlgmr.msra.gmra.mrb[16].mxu1 %v3193_v58  ;;  %v1676_v58 = vld [vmem:[%s3864_s5] ss:$0 sm:$0xff] }
 0x775   :  { %3027 = vmatpush3.bf16.msra.mxu1 %v3646_v62  ;;  %2519 = vmatprep.mubr.msk.f32.mxu1 %vm3261_vm0, %v3262_v1 }
 0x776   :  { %3028 = vmatprep.subr.bf16.mxu1 %v3260_v0 }
 0x779   :  { %3030 = vmatpush3.bf16.msra.mxu1 %v3650_v3 }
 0x77a   :  { %3031 = vmatprep.subr.bf16.mxu1 %v3260_v0 }
 0x77d   :  { %3033 = vmatpush3.bf16.msra.mxu1 %v3654_v6 }
 0x77e   :  { %3034 = vmatprep.subr.bf16.mxu1 %v3260_v0 }
 0x781   :  { %3036 = vmatpush3.bf16.msra.mxu1 %v3658_v12 }
 0x782   :  { %3037 = vmatprep.subr.bf16.mxu1 %v3260_v0 }
 0x785   :  { %3039 = vmatpush3.bf16.msra.mxu1 %v3662_v16 }
 0x786   :  { %3040 = vmatprep.subr.bf16.mxu1 %v3260_v0 }
 0x789   :  { %3042 = vmatpush3.bf16.msra.mxu1 %v3666_v19 }
 0x78a   :  { %3043 = vmatprep.subr.bf16.mxu1 %v3260_v0 }
 0x78d   :  { %3045 = vmatpush3.bf16.msra.mxu1 %v3670_v23 }
 0x78e   :  { %3046 = vmatprep.subr.bf16.mxu1 %v3260_v0 }
 0x791   :  { %3048 = vmatpush3.bf16.msra.mxu1 %v3674_v26 }
 0x792   :  { %3073 = vmatprep.subr.bf16.mxu1 %v3260_v0 }
 0x827   :  { %v3755_v8 = vpop.f32.mrb[14].mxu1 }
 0x828   :  { %v3757_v44 = vpop.f32.mrb[15].mxu1  ;;  %v945_v38 = vadd.f32 %v3755_v8, %v3734_v39 }
 0x829   :  { %v940_v29 = vadd.f32 %v3734_v39, %v3757_v44 }
 0x847   :  { %v1113_v46 = vpop.f32.mrb[16].mxu1 }
 0x848   :  { %v1117_v47 = vadd.f32 %v1113_v46, %v915_v45  ;;  %v2451_v48 = vpop.f32.mrb[17].mxu1 }
 0x84a   :  { %3194 = vtanh.f32 %v1117_v47 }
 0x854   :  { %v3195_v49 = vpop.eup %3194 }
 0x855   :  { %2485 = vmatmul.mubr.f32.vlgmr.msra.gmra.mrb[18].mxu0 %v3195_v49 }
 0x856   :  { %3051 = vmatpush3.bf16.msra.mxu0 %v3646_v62  ;;  %2554 = vmatprep.mubr.msk.f32.mxu0 %vm3261_vm0, %v3262_v1 }
 0x857   :  { %3052 = vmatprep.subr.bf16.mxu0 %v3260_v0 }
 0x85a   :  { %3054 = vmatpush3.bf16.msra.mxu0 %v3650_v3 }
 0x85b   :  { %3055 = vmatprep.subr.bf16.mxu0 %v3260_v0 }
 0x85e   :  { %3057 = vmatpush3.bf16.msra.mxu0 %v3654_v6 }
 0x85f   :  { %3058 = vmatprep.subr.bf16.mxu0 %v3260_v0 }
 0x862   :  { %3060 = vmatpush3.bf16.msra.mxu0 %v3658_v12 }
 0x863   :  { %3061 = vmatprep.subr.bf16.mxu0 %v3260_v0 }
 0x866   :  { %3063 = vmatpush3.bf16.msra.mxu0 %v3662_v16 }
 0x867   :  { %3064 = vmatprep.subr.bf16.mxu0 %v3260_v0 }
 0x86a   :  { %3066 = vmatpush3.bf16.msra.mxu0 %v3666_v19 }
 0x86b   :  { %3067 = vmatprep.subr.bf16.mxu0 %v3260_v0 }
 0x86e   :  { %3069 = vmatpush3.bf16.msra.mxu0 %v3670_v23 }
 0x86f   :  { %3070 = vmatprep.subr.bf16.mxu0 %v3260_v0 }
 0x872   :  { %3072 = vmatpush3.bf16.msra.mxu0 %v3674_v26 }
 0x873   :  { %3097 = vmatprep.subr.bf16.mxu0 %v3260_v0 }
 0x928   :  { %v1186_v51 = vpop.f32.mrb[18].mxu0 }
 0x929   :  { %v1190_v52 = vadd.f32 %v1186_v51, %v920_v50  ;;  %v2486_v53 = vpop.f32.mrb[19].mxu0 }
 0x92b   :  { %3196 = vtanh.f32 %v1190_v52 }
 0x935   :  { %v3197_v54 = vpop.eup %3196 }
 0x936   :  { %2520 = vmatmul.mubr.f32.vlgmr.msra.gmra.mrb[18].mxu1 %v3197_v54 }
 0x937   :  { %3075 = vmatpush3.bf16.msra.mxu1 %v3646_v62  ;;  %2589 = vmatprep.mubr.msk.f32.mxu1 %vm3261_vm0, %v3262_v1 }
 0x938   :  { %3076 = vmatprep.subr.bf16.mxu1 %v3260_v0 }
 0x93b   :  { %3078 = vmatpush3.bf16.msra.mxu1 %v3650_v3 }
 0x93c   :  { %3079 = vmatprep.subr.bf16.mxu1 %v3260_v0 }
 0x93f   :  { %3081 = vmatpush3.bf16.msra.mxu1 %v3654_v6 }
 0x940   :  { %3082 = vmatprep.subr.bf16.mxu1 %v3260_v0 }
 0x943   :  { %3084 = vmatpush3.bf16.msra.mxu1 %v3658_v12 }
 0x944   :  { %3085 = vmatprep.subr.bf16.mxu1 %v3260_v0 }
 0x947   :  { %3087 = vmatpush3.bf16.msra.mxu1 %v3662_v16 }
 0x948   :  { %3088 = vmatprep.subr.bf16.mxu1 %v3260_v0 }
 0x94b   :  { %3090 = vmatpush3.bf16.msra.mxu1 %v3666_v19 }
 0x94c   :  { %3091 = vmatprep.subr.bf16.mxu1 %v3260_v0 }
 0x94f   :  { %3093 = vmatpush3.bf16.msra.mxu1 %v3670_v23 }
 0x950   :  { %3094 = vmatprep.subr.bf16.mxu1 %v3260_v0 }
 0x953   :  { %3096 = vmatpush3.bf16.msra.mxu1 %v3674_v26 }
 0x954   :  { %3121 = vmatprep.subr.bf16.mxu1 %v3260_v0 }
 0xa09   :  { %v1259_v56 = vpop.f32.mrb[18].mxu1 }
 0xa0a   :  { %v1263_v57 = vadd.f32 %v1259_v56, %v925_v55  ;;  %v2521_v59 = vpop.f32.mrb[19].mxu1 }
 0xa0c   :  { %3198 = vtanh.f32 %v1263_v57 }
 0xa16   :  { %v3199_v60 = vpop.eup %3198 }
 0xa17   :  { %2555 = vmatmul.mubr.f32.vlgmr.msra.gmra.mrb[20].mxu0 %v3199_v60 }
 0xa18   :  { %3099 = vmatpush3.bf16.msra.mxu0 %v3646_v62  ;;  %2624 = vmatprep.mubr.msk.f32.mxu0 %vm3261_vm0, %v3262_v1 }
 0xa19   :  { %3100 = vmatprep.subr.bf16.mxu0 %v3260_v0 }
 0xa1c   :  { %3102 = vmatpush3.bf16.msra.mxu0 %v3650_v3 }
 0xa1d   :  { %3103 = vmatprep.subr.bf16.mxu0 %v3260_v0 }
 0xa20   :  { %3105 = vmatpush3.bf16.msra.mxu0 %v3654_v6 }
 0xa21   :  { %3106 = vmatprep.subr.bf16.mxu0 %v3260_v0 }
 0xa24   :  { %3108 = vmatpush3.bf16.msra.mxu0 %v3658_v12 }
 0xa25   :  { %3109 = vmatprep.subr.bf16.mxu0 %v3260_v0 }
 0xa28   :  { %3111 = vmatpush3.bf16.msra.mxu0 %v3662_v16 }
 0xa29   :  { %3112 = vmatprep.subr.bf16.mxu0 %v3260_v0 }
 0xa2c   :  { %3114 = vmatpush3.bf16.msra.mxu0 %v3666_v19 }
 0xa2d   :  { %3115 = vmatprep.subr.bf16.mxu0 %v3260_v0 }
 0xa30   :  { %3117 = vmatpush3.bf16.msra.mxu0 %v3670_v23 }
 0xa31   :  { %3118 = vmatprep.subr.bf16.mxu0 %v3260_v0 }
 0xa34   :  { %3120 = vmatpush3.bf16.msra.mxu0 %v3674_v26 }
 0xa35   :  { %3145 = vmatprep.subr.bf16.mxu0 %v3260_v0 }
 0xaea   :  { %v1332_v63 = vpop.f32.mrb[20].mxu0 }
 0xaeb   :  { %v1336_v2 = vadd.f32 %v1332_v63, %v930_v61  ;;  %v2556_v4 = vpop.f32.mrb[21].mxu0 }
 0xaed   :  { %3200 = vtanh.f32 %v1336_v2 }
 0xaf7   :  { %v3201_v5 = vpop.eup %3200 }
 0xaf8   :  { %2590 = vmatmul.mubr.f32.vlgmr.msra.gmra.mrb[20].mxu1 %v3201_v5 }
 0xaf9   :  { %3123 = vmatpush3.bf16.msra.mxu1 %v3646_v62  ;;  %2659 = vmatprep.mubr.msk.f32.mxu1 %vm3261_vm0, %v3262_v1  ;;  %v935_v62 = vadd.f32 %v3701_v21, %v3734_v39  ;;  %v1569_v21 = vld [vmem:[#allocation5 + $0x60] sm:$0xff] }
 0xafa   :  { %3124 = vmatprep.subr.bf16.mxu1 %v3260_v0  ;;  %v3164_v34 = vpack.c.bf16 %v1570_v28, %v1569_v21 }
 0xafd   :  { %3126 = vmatpush3.bf16.msra.mxu1 %v3650_v3 }
 0xafe   :  { %3127 = vmatprep.subr.bf16.mxu1 %v3260_v0 }
 0xb01   :  { %3129 = vmatpush3.bf16.msra.mxu1 %v3654_v6 }
 0xb02   :  { %3130 = vmatprep.subr.bf16.mxu1 %v3260_v0 }
 0xb05   :  { %3132 = vmatpush3.bf16.msra.mxu1 %v3658_v12  ;;  %v1557_v12 = vld [vmem:[#allocation5] sm:$0xff] }
 0xb06   :  { %3133 = vmatprep.subr.bf16.mxu1 %v3260_v0 }
 0xb09   :  { %3135 = vmatpush3.bf16.msra.mxu1 %v3662_v16  ;;  %v3146_v16 = vpack.c.bf16 %v1558_v13, %v1557_v12 }
 0xb0a   :  { %3136 = vmatprep.subr.bf16.mxu1 %v3260_v0 }
 0xb0d   :  { %3138 = vmatpush3.bf16.msra.mxu1 %v3666_v19  ;;  %v1561_v19 = vld [vmem:[#allocation5 + $0x20] sm:$0xff] }
 0xb0e   :  { %3139 = vmatprep.subr.bf16.mxu1 %v3260_v0  ;;  %v3152_v22 = vpack.c.bf16 %v1562_v20, %v1561_v19 }
 0xb11   :  { %3141 = vmatpush3.bf16.msra.mxu1 %v3670_v23  ;;  %v1563_v23 = vld [vmem:[#allocation5 + $0x30] sm:$0xff] }
 0xb12   :  { %3142 = vmatprep.subr.bf16.mxu1 %v3260_v0  ;;  %v3155_v25 = vpack.c.bf16 %v1564_v24, %v1563_v23 }
 0xb15   :  { %3144 = vmatpush3.bf16.msra.mxu1 %v3674_v26  ;;  %v1566_v26 = vld [vmem:[#allocation5 + $0x48] sm:$0xff] }
 0xbcb   :  { %v1405_v3 = vpop.f32.mrb[20].mxu1 }
 0xbcc   :  { %v1409_v6 = vadd.f32 %v1405_v3, %v935_v62  ;;  %v2591_v7 = vpop.f32.mrb[21].mxu1 }
 0xbce   :  { %3202 = vtanh.f32 %v1409_v6 }
 0xbd8   :  { %v3203_v11 = vpop.eup %3202 }
 0xbd9   :  { %2625 = vmatmul.mubr.f32.vlgmr.msra.gmra.mrb[22].mxu0 %v3203_v11 }
 0xbda   :  { %2694 = vmatprep.mubr.msk.f32.mxu0 %vm3261_vm0, %v3262_v1  ;;  %3147 = vmatpush3.bf16.msra.mxu0 %v3146_v16  ;;  %v1565_v1 = vld [vmem:[#allocation5 + $0x40] sm:$0xff] }
 0xbdb   :  { %3148 = vmatprep.subr.bf16.mxu0 %v3260_v0  ;;  %v3158_v27 = vpack.c.bf16 %v1566_v26, %v1565_v1 }
 0xbde   :  { %3150 = vmatpush3.bf16.msra.mxu0 %v3149_v18 }
 0xbdf   :  { %3151 = vmatprep.subr.bf16.mxu0 %v3260_v0 }
 0xbe2   :  { %3153 = vmatpush3.bf16.msra.mxu0 %v3152_v22 }
 0xbe3   :  { %3154 = vmatprep.subr.bf16.mxu0 %v3260_v0 }
 0xbe6   :  { %3156 = vmatpush3.bf16.msra.mxu0 %v3155_v25 }
 0xbe7   :  { %3157 = vmatprep.subr.bf16.mxu0 %v3260_v0 }
 0xbea   :  { %3159 = vmatpush3.bf16.msra.mxu0 %v3158_v27 }
 0xbeb   :  { %3160 = vmatprep.subr.bf16.mxu0 %v3260_v0 }
 0xbee   :  { %3162 = vmatpush3.bf16.msra.mxu0 %v3161_v15 }
 0xbef   :  { %3163 = vmatprep.subr.bf16.mxu0 %v3260_v0 }
 0xbf2   :  { %3165 = vmatpush3.bf16.msra.mxu0 %v3164_v34 }
 0xbf3   :  { %3166 = vmatprep.subr.bf16.mxu0 %v3260_v0 }
 0xbf6   :  { %3168 = vmatpush3.bf16.msra.mxu0 %v3167_v37 }
 0xcac   :  { %v1478_v30 = vpop.f32.mrb[22].mxu0 }
 0xcad   :  { %v1482_v31 = vadd.f32 %v1478_v30, %v940_v29  ;;  %v2626_v32 = vpop.f32.mrb[23].mxu0 }
 0xcaf   :  { %3204 = vtanh.f32 %v1482_v31 }
 0xcb9   :  { %v3205_v10 = vpop.eup %3204 }
 0xcba   :  { %2660 = vmatmul.mubr.f32.vlgmr.msra.gmra.mrb[22].mxu1 %v3205_v10 }
 0xd8d   :  { %v1551_v40 = vpop.f32.mrb[22].mxu1 }
 0xd8e   :  { %v1555_v41 = vadd.f32 %v1551_v40, %v945_v38  ;;  %v2661_v42 = vpop.f32.mrb[23].mxu1 }
 0xd90   :  { %3206 = vtanh.f32 %v1555_v41 }
 0xd9a   :  { %v3207_v43 = vpop.eup %3206 }
 0xd9b   :  { %2695 = vmatmul.mubr.f32.vlgmr.msra.gmra.mrb[24].mxu0 %v3207_v43 }
 0xe6e   :  { %v1646_v44 = vpop.f32.mrb[24].mxu0 }
 0xe6f   :  { %v1647_v45 = vadd.f32 %v1676_v58, %v1646_v44  ;;  %v2696_v46 = vpop.f32.mrb[25].mxu0 }
 0xe71   :  { %1650 = vst [vmem:[%s3865_s6] sm:$0xff] %v1647_v45 }
 0xe72   :  { %1655 = vsyncpa [#allocation4], 1 }
 0xe73   :  { %1656 = vsyncpa [#allocation6], 1 }

</bundles_post_ra>
